<compile_context>
chip_gen: v7x
topology: tpu7x:2x2x1
jax: 0.10.0
libtpu: 0.0.40
codegen_flags: <defaults>
</compile_context>

<pallas_src>
import jax
import jax.numpy as jnp
import numpy as np
from jax import lax
from jax.experimental import pallas as pl
from jax.experimental.pallas import tpu as pltpu

LANE = 128


def _round_up(n, m):
    return ((n + m - 1) // m) * m


def birnn_kernel(x_ref,      # [TB, T, D]   compute dtype, batch-major input tile
                 w_ih_ref,   # [D, 2Hp]     [W_ih_f^T | W_ih_b^T]  (zero padded)
                 w_hh_ref,   # [2Hp, 2Hp]   block-diag(W_hh_f^T, W_hh_b^T)
                 b_ih_ref,   # [1, 2Hp]     f32 [b_ih_f+b_hh_f | b_ih_b+b_hh_b]
                 w_l_ref,    # [2Hp, Op]    [W_l[:, :H]^T ; W_l[:, H:]^T]
                 b_l_ref,    # [1, Op]      f32
                 out_ref,    # [TB, T, Op]  f32, batch-major output tile
                 xtm_ref,    # scratch [T, TB, D]  time-major copy of the input tile
                 xwf_ref,    # scratch [T, TB, Hp] f32: x@W_ih_f + b_f, then h_fwd
                 xwb_ref):   # scratch [T, TB, Hp] f32: x@W_ih_b + b_b, then h_bwd
    TB, T, D = x_ref.shape
    H2 = w_hh_ref.shape[0]
    Hp = H2 // 2

    # ---- Phase 0a: one cheap in-VMEM reorder of x to time-major.  Replaces the
    #      wrapper-side HBM transpose of the previous version (saves an HBM pass).
    for t in range(T):                       # static T, unrolled sublane copies
        xtm_ref[t] = x_ref[:, t, :]

    # ---- Phase 0b: fused fwd+bwd input projection, hoisted out of the recurrence:
    #      ONE [T*TB, D] x [D, 2Hp] MXU matmul, biases (b_ih + b_hh) folded in.
    proj = (jnp.dot(xtm_ref[...].reshape(T * TB, D), w_ih_ref[...],
                    preferred_element_type=jnp.float32)
            + b_ih_ref[...])                 # [T*TB, 2Hp] f32
    xwf_ref[...] = proj[:, :Hp].reshape(T, TB, Hp)
    xwb_ref[...] = proj[:, Hp:].reshape(T, TB, Hp)

    # ---- Phase 1: fused bidirectional recurrence.  One 256-lane matmul per step
    #      against the block-diagonal W_hh; h carried in vregs; per-step results are
    #      written back IN PLACE over the projection rows consumed this very step.
    w_hh = w_hh_ref[...]
    h0 = jnp.zeros((TB, H2), jnp.float32)
    # Larger batch tiles -> lower unroll so the vreg-resident carries do not spill.
    unroll = min(T, 8 if TB <= 32 else (4 if TB <= 64 else 2))

    def step(t, h):
        rt = T - 1 - t
        pre = jnp.concatenate([xwf_ref[t], xwb_ref[rt]], axis=-1)     # [TB, 2Hp]
        pre = pre + jnp.dot(h.astype(w_hh.dtype), w_hh,
                            preferred_element_type=jnp.float32)
        h_new = jnp.tanh(pre)                                         # f32 VPU/EUP
        xwf_ref[t] = h_new[:, :Hp]           # forward hidden state at time t
        xwb_ref[rt] = h_new[:, Hp:]          # backward hidden state at time rt
        return h_new

    lax.fori_loop(0, T, step, h0, unroll=unroll)

    # ---- Phase 2: output head, pulled out of the recurrence.  Each time step is a
    #      [TB, 2Hp] x [2Hp, Op] matmul (full 256-deep contraction) stored
    #      batch-major, so the wrapper never transposes the output in HBM.
    w_l = w_l_ref[...]
    b_l = b_l_ref[...]
    for t in range(T):                       # static, mutually independent matmuls
        rec_t = jnp.concatenate([xwf_ref[t], xwb_ref[t]], axis=-1).astype(w_l.dtype)
        out_ref[:, t, :] = (jnp.dot(rec_t, w_l, preferred_element_type=jnp.float32)
                            + b_l).astype(out_ref.dtype)


def prepare_birnn_params(params, *, compute_dtype=jnp.bfloat16):
    """One-time weight prep (pad to 128 lanes, transpose, fuse fwd/bwd, fold biases).

    Cache the result; it must not be redone on every forward call.
    """
    H, D = params["w_ih_f"].shape
    O = params["b_l"].shape[0]
    Hp, Op = _round_up(H, LANE), _round_up(O, LANE)

    def pad2(w, r, c):
        return jnp.pad(w, ((0, r - w.shape[0]), (0, c - w.shape[1])))

    # Fused input projection [D, 2Hp]: lanes 0:Hp forward, Hp:2Hp backward.
    w_ih = jnp.concatenate([pad2(params["w_ih_f"].T, D, Hp),
                            pad2(params["w_ih_b"].T, D, Hp)], axis=1)
    # Block-diagonal recurrent weight [2Hp, 2Hp] (directions never mix).
    zero = jnp.zeros((Hp, Hp), jnp.float32)
    w_hh = jnp.concatenate(
        [jnp.concatenate([pad2(params["w_hh_f"].T, Hp, Hp), zero], axis=1),
         jnp.concatenate([zero, pad2(params["w_hh_b"].T, Hp, Hp)], axis=1)], axis=0)
    # Folded biases [1, 2Hp].
    b_ih = jnp.concatenate(
        [jnp.pad(params["b_ih_f"] + params["b_hh_f"], (0, Hp - H)),
         jnp.pad(params["b_ih_b"] + params["b_hh_b"], (0, Hp - H))]).reshape(1, 2 * Hp)
    # Fused head weight [2Hp, Op]: [h_f | h_b] @ w_l == h_f@W_l[:, :H].T + h_b@W_l[:, H:].T
    wl = params["w_l"]
    w_l = jnp.concatenate([pad2(wl[:, :H].T, Hp, Op),
                           pad2(wl[:, H:].T, Hp, Op)], axis=0)
    b_l = jnp.pad(params["b_l"], (0, Op - O)).reshape(1, Op)

    return {
        "w_ih": w_ih.astype(compute_dtype),
        "w_hh": w_hh.astype(compute_dtype),
        "b_ih": b_ih.astype(jnp.float32),
        "w_l": w_l.astype(compute_dtype),
        "b_l": b_l.astype(jnp.float32),
        "dims": (H, O, Hp, Op),
    }


def bidirectional_rnn(x, prepped, *, batch_tile=None):
    """x: [B, T, input_size] (batch_first) -> [B, T, output_size], like the module."""
    B, T, D = x.shape
    H, O, Hp, Op = prepped["dims"]
    H2 = 2 * Hp
    compute_dtype = prepped["w_ih"].dtype

    # Batch tile: multiple of 8, large enough to fill MXU rows, but leaves >= 2 grid
    # steps (both TensorCores on v7x) once the batch is big enough.
    if batch_tile is None:
        TB = max(8, min(128, 8 * ((B + 15) // 16)))
    else:
        TB = max(8, _round_up(batch_tile, 8))
    Bp = _round_up(B, TB)
    grid = (Bp // TB,)

    xp = x if Bp == B else jnp.pad(x, ((0, Bp - B), (0, 0), (0, 0)))
    xp = xp.astype(compute_dtype)            # bf16 MXU inputs; halves the x DMA

    # Explicit VMEM budget (v7x has 64 MiB physical / 32 MiB default scoped).
    itw = jnp.dtype(compute_dtype).itemsize
    est_bytes = (
        2 * TB * T * D * itw                                  # x tile (double-buffered)
        + 2 * TB * T * Op * 4                                 # out tile (double-buffered)
        + 2 * (H2 * (D + H2 + Op) * itw + (H2 + Op) * 4)      # weights + biases
        + T * TB * D * itw + 2 * T * TB * Hp * 4              # scratch
    )
    vmem_limit = int(min(max(2 * est_bytes, 32 << 20), 48 << 20))

    wspec = lambda r, c: pl.BlockSpec((r, c), lambda b: (0, 0))

    out = pl.pallas_call(
        birnn_kernel,
        out_shape=jax.ShapeDtypeStruct((Bp, T, Op), jnp.float32),
        grid=grid,
        in_specs=[
            pl.BlockSpec((TB, T, D), lambda b: (b, 0, 0)),    # x, batch-tiled, no transpose
            wspec(D, H2),                                      # fused W_ih
            wspec(H2, H2),                                     # block-diag W_hh
            wspec(1, H2),                                      # folded biases
            wspec(H2, Op),                                     # fused head weight
            wspec(1, Op),                                      # head bias
        ],
        out_specs=pl.BlockSpec((TB, T, Op), lambda b: (b, 0, 0)),
        scratch_shapes=[
            pltpu.VMEM((T, TB, D), compute_dtype),             # time-major x staging
            pltpu.VMEM((T, TB, Hp), jnp.float32),              # xw fwd -> h fwd (in place)
            pltpu.VMEM((T, TB, Hp), jnp.float32),              # xw bwd -> h bwd (in place)
        ],
        compiler_params=pltpu.CompilerParams(
            dimension_semantics=("parallel",),                 # batch tiles independent
            vmem_limit_bytes=vmem_limit),
    )(xp, prepped["w_ih"], prepped["w_hh"], prepped["b_ih"],
      prepped["w_l"], prepped["b_l"])

    # strip padding only; already batch_first
    return out[:B, :, :O]


def ref_birnn(x, params):
    """Pure-JAX f32 reference matching nn.RNN(bidirectional=True, batch_first=True) + Linear."""
    B, T, D = x.shape
    H = params["w_hh_f"].shape[0]

    def cell(w_ih, w_hh, b_ih, b_hh, xs):
        def step(h, x_t):
            h_new = jnp.tanh(x_t @ w_ih.T + b_ih + h @ w_hh.T + b_hh)
            return h_new, h_new
        h0 = jnp.zeros((B, H), jnp.float32)
        _, hs = lax.scan(step, h0, xs)
        return hs

    x_tm = jnp.transpose(x, (1, 0, 2))
    hf = cell(params["w_ih_f"], params["w_hh_f"],
              params["b_ih_f"], params["b_hh_f"], x_tm)
    hb = cell(params["w_ih_b"], params["w_hh_b"],
              params["b_ih_b"], params["b_hh_b"], x_tm[::-1])[::-1]
    rec = jnp.concatenate([hf, hb], axis=-1)                  # [T, B, 2H]
    out = rec @ params["w_l"].T + params["b_l"]
    return jnp.transpose(out, (1, 0, 2))


if __name__ == "__main__":
    B, T, D, H, O = 2, 8, 16, 32, 16   # batch, seq, input_size, hidden_size, output_size

    key = jax.random.PRNGKey(0)
    keys = jax.random.split(key, 11)
    k = 1.0 / np.sqrt(H)
    u = lambda kk, shape: jax.random.uniform(kk, shape, jnp.float32, -k, k)

    params = {
        "w_ih_f": u(keys[0], (H, D)),
        "w_hh_f": u(keys[1], (H, H)),
        "b_ih_f": u(keys[2], (H,)),
        "b_hh_f": u(keys[3], (H,)),
        "w_ih_b": u(keys[4], (H, D)),
        "w_hh_b": u(keys[5], (H, H)),
        "b_ih_b": u(keys[6], (H,)),
        "b_hh_b": u(keys[7], (H,)),
        "w_l":    u(keys[8], (O, 2 * H)),
        "b_l":    u(keys[9], (O,)),
    }
    x = jax.random.normal(keys[10], (B, T, D), jnp.float32)

    prepped = prepare_birnn_params(params)          # one-time weight prep (cacheable)
    out = jax.block_until_ready(bidirectional_rnn(x, prepped))
    ref = jax.block_until_ready(ref_birnn(x, params))

    assert out.shape == (B, T, O)
    # bf16 MXU inputs with f32 accumulation -> tolerance loosened vs pure-f32 reference.
    np.testing.assert_allclose(np.asarray(out), np.asarray(ref), rtol=3e-2, atol=5e-2)
    print("KERNEL_OK")
</pallas_src>

<mosaic_0001>
module attributes {stable_mosaic.version = 11 : i64} {
  func.func @birnn_kernel(%arg0: i32, %arg1: memref<8x8x16xbf16, #tpu.memory_space<vmem>>, %arg2: memref<16x256xbf16, #tpu.memory_space<vmem>>, %arg3: memref<256x256xbf16, #tpu.memory_space<vmem>>, %arg4: memref<1x256xf32, #tpu.memory_space<vmem>>, %arg5: memref<256x128xbf16, #tpu.memory_space<vmem>>, %arg6: memref<1x128xf32, #tpu.memory_space<vmem>>, %arg7: memref<8x8x128xf32, #tpu.memory_space<vmem>>, %arg8: memref<8x8x16xbf16, #tpu.memory_space<vmem>>, %arg9: memref<8x8x128xf32, #tpu.memory_space<vmem>>, %arg10: memref<8x8x128xf32, #tpu.memory_space<vmem>>) attributes {dimension_semantics = [#tpu.dimension_semantics<parallel>], iteration_bounds = array<i64: 1>, scalar_prefetch = 0 : i64, scratch_operands = 3 : i64, tpu.core_type = #tpu.core_type<tc>, window_params = [{transform_indices = @transform_0, window_bounds = array<i64: 8, 8, 16>}, {pipeline_mode = #tpu.pipeline_mode<synchronous>, transform_indices = @transform_1, window_bounds = array<i64: 16, 256>}, {pipeline_mode = #tpu.pipeline_mode<synchronous>, transform_indices = @transform_2, window_bounds = array<i64: 256, 256>}, {pipeline_mode = #tpu.pipeline_mode<synchronous>, transform_indices = @transform_3, window_bounds = array<i64: 1, 256>}, {pipeline_mode = #tpu.pipeline_mode<synchronous>, transform_indices = @transform_4, window_bounds = array<i64: 256, 128>}, {pipeline_mode = #tpu.pipeline_mode<synchronous>, transform_indices = @transform_5, window_bounds = array<i64: 1, 128>}, {transform_indices = @transform_6, window_bounds = array<i64: 8, 8, 128>}]} {
    %c0 = arith.constant 0 : index
    %c0_0 = arith.constant 0 : index
    %c0_1 = arith.constant 0 : index
    %0 = vector.load %arg1[%c0, %c0_0, %c0_1] : memref<8x8x16xbf16, #tpu.memory_space<vmem>>, vector<8x1x16xbf16>
    %1 = vector.shape_cast %0 : vector<8x1x16xbf16> to vector<8x16xbf16>
    %c0_2 = arith.constant 0 : index
    %c0_3 = arith.constant 0 : index
    %c0_4 = arith.constant 0 : index
    %2 = vector.load %arg8[%c0_2, %c0_3, %c0_4] : memref<8x8x16xbf16, #tpu.memory_space<vmem>>, vector<1x8x16xbf16>
    %3 = vector.shape_cast %2 : vector<1x8x16xbf16> to vector<8x16xbf16>
    %4 = vector.shape_cast %1 : vector<8x16xbf16> to vector<1x8x16xbf16>
    tpu.vector_store %arg8[%c0_2, %c0_3, %c0_4], %4 {strides = array<i32>} : memref<8x8x16xbf16, #tpu.memory_space<vmem>>, vector<1x8x16xbf16>,
    %c0_5 = arith.constant 0 : index
    %c1 = arith.constant 1 : index
    %c0_6 = arith.constant 0 : index
    %5 = vector.load %arg1[%c0_5, %c1, %c0_6] : memref<8x8x16xbf16, #tpu.memory_space<vmem>>, vector<8x1x16xbf16>
    %6 = vector.shape_cast %5 : vector<8x1x16xbf16> to vector<8x16xbf16>
    %c1_7 = arith.constant 1 : index
    %c0_8 = arith.constant 0 : index
    %c0_9 = arith.constant 0 : index
    %7 = vector.load %arg8[%c1_7, %c0_8, %c0_9] : memref<8x8x16xbf16, #tpu.memory_space<vmem>>, vector<1x8x16xbf16>
    %8 = vector.shape_cast %7 : vector<1x8x16xbf16> to vector<8x16xbf16>
    %9 = vector.shape_cast %6 : vector<8x16xbf16> to vector<1x8x16xbf16>
    tpu.vector_store %arg8[%c1_7, %c0_8, %c0_9], %9 {strides = array<i32>} : memref<8x8x16xbf16, #tpu.memory_space<vmem>>, vector<1x8x16xbf16>,
    %c0_10 = arith.constant 0 : index
    %c2 = arith.constant 2 : index
    %c0_11 = arith.constant 0 : index
    %10 = vector.load %arg1[%c0_10, %c2, %c0_11] : memref<8x8x16xbf16, #tpu.memory_space<vmem>>, vector<8x1x16xbf16>
    %11 = vector.shape_cast %10 : vector<8x1x16xbf16> to vector<8x16xbf16>
    %c2_12 = arith.constant 2 : index
    %c0_13 = arith.constant 0 : index
    %c0_14 = arith.constant 0 : index
    %12 = vector.load %arg8[%c2_12, %c0_13, %c0_14] : memref<8x8x16xbf16, #tpu.memory_space<vmem>>, vector<1x8x16xbf16>
    %13 = vector.shape_cast %12 : vector<1x8x16xbf16> to vector<8x16xbf16>
    %14 = vector.shape_cast %11 : vector<8x16xbf16> to vector<1x8x16xbf16>
    tpu.vector_store %arg8[%c2_12, %c0_13, %c0_14], %14 {strides = array<i32>} : memref<8x8x16xbf16, #tpu.memory_space<vmem>>, vector<1x8x16xbf16>,
    %c0_15 = arith.constant 0 : index
    %c3 = arith.constant 3 : index
    %c0_16 = arith.constant 0 : index
    %15 = vector.load %arg1[%c0_15, %c3, %c0_16] : memref<8x8x16xbf16, #tpu.memory_space<vmem>>, vector<8x1x16xbf16>
    %16 = vector.shape_cast %15 : vector<8x1x16xbf16> to vector<8x16xbf16>
    %c3_17 = arith.constant 3 : index
    %c0_18 = arith.constant 0 : index
    %c0_19 = arith.constant 0 : index
    %17 = vector.load %arg8[%c3_17, %c0_18, %c0_19] : memref<8x8x16xbf16, #tpu.memory_space<vmem>>, vector<1x8x16xbf16>
    %18 = vector.shape_cast %17 : vector<1x8x16xbf16> to vector<8x16xbf16>
    %19 = vector.shape_cast %16 : vector<8x16xbf16> to vector<1x8x16xbf16>
    tpu.vector_store %arg8[%c3_17, %c0_18, %c0_19], %19 {strides = array<i32>} : memref<8x8x16xbf16, #tpu.memory_space<vmem>>, vector<1x8x16xbf16>,
    %c0_20 = arith.constant 0 : index
    %c4 = arith.constant 4 : index
    %c0_21 = arith.constant 0 : index
    %20 = vector.load %arg1[%c0_20, %c4, %c0_21] : memref<8x8x16xbf16, #tpu.memory_space<vmem>>, vector<8x1x16xbf16>
    %21 = vector.shape_cast %20 : vector<8x1x16xbf16> to vector<8x16xbf16>
    %c4_22 = arith.constant 4 : index
    %c0_23 = arith.constant 0 : index
    %c0_24 = arith.constant 0 : index
    %22 = vector.load %arg8[%c4_22, %c0_23, %c0_24] : memref<8x8x16xbf16, #tpu.memory_space<vmem>>, vector<1x8x16xbf16>
    %23 = vector.shape_cast %22 : vector<1x8x16xbf16> to vector<8x16xbf16>
    %24 = vector.shape_cast %21 : vector<8x16xbf16> to vector<1x8x16xbf16>
    tpu.vector_store %arg8[%c4_22, %c0_23, %c0_24], %24 {strides = array<i32>} : memref<8x8x16xbf16, #tpu.memory_space<vmem>>, vector<1x8x16xbf16>,
    %c0_25 = arith.constant 0 : index
    %c5 = arith.constant 5 : index
    %c0_26 = arith.constant 0 : index
    %25 = vector.load %arg1[%c0_25, %c5, %c0_26] : memref<8x8x16xbf16, #tpu.memory_space<vmem>>, vector<8x1x16xbf16>
    %26 = vector.shape_cast %25 : vector<8x1x16xbf16> to vector<8x16xbf16>
    %c5_27 = arith.constant 5 : index
    %c0_28 = arith.constant 0 : index
    %c0_29 = arith.constant 0 : index
    %27 = vector.load %arg8[%c5_27, %c0_28, %c0_29] : memref<8x8x16xbf16, #tpu.memory_space<vmem>>, vector<1x8x16xbf16>
    %28 = vector.shape_cast %27 : vector<1x8x16xbf16> to vector<8x16xbf16>
    %29 = vector.shape_cast %26 : vector<8x16xbf16> to vector<1x8x16xbf16>
    tpu.vector_store %arg8[%c5_27, %c0_28, %c0_29], %29 {strides = array<i32>} : memref<8x8x16xbf16, #tpu.memory_space<vmem>>, vector<1x8x16xbf16>,
    %c0_30 = arith.constant 0 : index
    %c6 = arith.constant 6 : index
    %c0_31 = arith.constant 0 : index
    %30 = vector.load %arg1[%c0_30, %c6, %c0_31] : memref<8x8x16xbf16, #tpu.memory_space<vmem>>, vector<8x1x16xbf16>
    %31 = vector.shape_cast %30 : vector<8x1x16xbf16> to vector<8x16xbf16>
    %c6_32 = arith.constant 6 : index
    %c0_33 = arith.constant 0 : index
    %c0_34 = arith.constant 0 : index
    %32 = vector.load %arg8[%c6_32, %c0_33, %c0_34] : memref<8x8x16xbf16, #tpu.memory_space<vmem>>, vector<1x8x16xbf16>
    %33 = vector.shape_cast %32 : vector<1x8x16xbf16> to vector<8x16xbf16>
    %34 = vector.shape_cast %31 : vector<8x16xbf16> to vector<1x8x16xbf16>
    tpu.vector_store %arg8[%c6_32, %c0_33, %c0_34], %34 {strides = array<i32>} : memref<8x8x16xbf16, #tpu.memory_space<vmem>>, vector<1x8x16xbf16>,
    %c0_35 = arith.constant 0 : index
    %c7 = arith.constant 7 : index
    %c0_36 = arith.constant 0 : index
    %35 = vector.load %arg1[%c0_35, %c7, %c0_36] : memref<8x8x16xbf16, #tpu.memory_space<vmem>>, vector<8x1x16xbf16>
    %36 = vector.shape_cast %35 : vector<8x1x16xbf16> to vector<8x16xbf16>
    %c7_37 = arith.constant 7 : index
    %c0_38 = arith.constant 0 : index
    %c0_39 = arith.constant 0 : index
    %37 = vector.load %arg8[%c7_37, %c0_38, %c0_39] : memref<8x8x16xbf16, #tpu.memory_space<vmem>>, vector<1x8x16xbf16>
    %38 = vector.shape_cast %37 : vector<1x8x16xbf16> to vector<8x16xbf16>
    %39 = vector.shape_cast %36 : vector<8x16xbf16> to vector<1x8x16xbf16>
    tpu.vector_store %arg8[%c7_37, %c0_38, %c0_39], %39 {strides = array<i32>} : memref<8x8x16xbf16, #tpu.memory_space<vmem>>, vector<1x8x16xbf16>,
    %c0_40 = arith.constant 0 : index
    %c0_41 = arith.constant 0 : index
    %c0_42 = arith.constant 0 : index
    %40 = vector.load %arg8[%c0_40, %c0_41, %c0_42] : memref<8x8x16xbf16, #tpu.memory_space<vmem>>, vector<8x8x16xbf16>
    %41 = vector.shape_cast %40 : vector<8x8x16xbf16> to vector<64x16xbf16>
    %c0_43 = arith.constant 0 : index
    %c0_44 = arith.constant 0 : index
    %42 = vector.load %arg2[%c0_43, %c0_44] : memref<16x256xbf16, #tpu.memory_space<vmem>>, vector<16x256xbf16>
    %cst = arith.constant dense<0.000000e+00> : vector<64x256xf32>
    %43 = tpu.matmul %41, %42, %cst {dimension_numbers = #tpu.dot_dimension_numbers<[1], [0], [0], [1], [0, 0, 1, 1], [], []>} : vector<64x16xbf16>, vector<16x256xbf16>, vector<64x256xf32> -> vector<64x256xf32>
    %c0_45 = arith.constant 0 : index
    %c0_46 = arith.constant 0 : index
    %44 = vector.load %arg4[%c0_45, %c0_46] : memref<1x256xf32, #tpu.memory_space<vmem>>, vector<1x256xf32>
    %45 = vector.broadcast %44 : vector<1x256xf32> to vector<64x256xf32>
    %46 = arith.addf %43, %45 : vector<64x256xf32>
    %47 = vector.extract_strided_slice %46 {offsets = [0, 0], sizes = [64, 128], strides = [1, 1]} : vector<64x256xf32> to vector<64x128xf32>
    %48 = vector.shape_cast %47 : vector<64x128xf32> to vector<8x8x128xf32>
    %c0_47 = arith.constant 0 : index
    %c0_48 = arith.constant 0 : index
    %c0_49 = arith.constant 0 : index
    %49 = vector.load %arg9[%c0_47, %c0_48, %c0_49] : memref<8x8x128xf32, #tpu.memory_space<vmem>>, vector<8x8x128xf32>
    tpu.vector_store %arg9[%c0_47, %c0_48, %c0_49], %48 {strides = array<i32>} : memref<8x8x128xf32, #tpu.memory_space<vmem>>, vector<8x8x128xf32>,
    %50 = vector.extract_strided_slice %46 {offsets = [0, 128], sizes = [64, 128], strides = [1, 1]} : vector<64x256xf32> to vector<64x128xf32>
    %51 = vector.shape_cast %50 : vector<64x128xf32> to vector<8x8x128xf32>
    %c0_50 = arith.constant 0 : index
    %c0_51 = arith.constant 0 : index
    %c0_52 = arith.constant 0 : index
    %52 = vector.load %arg10[%c0_50, %c0_51, %c0_52] : memref<8x8x128xf32, #tpu.memory_space<vmem>>, vector<8x8x128xf32>
    tpu.vector_store %arg10[%c0_50, %c0_51, %c0_52], %51 {strides = array<i32>} : memref<8x8x128xf32, #tpu.memory_space<vmem>>, vector<8x8x128xf32>,
    %c0_53 = arith.constant 0 : index
    %c0_54 = arith.constant 0 : index
    %53 = vector.load %arg3[%c0_53, %c0_54] : memref<256x256xbf16, #tpu.memory_space<vmem>>, vector<256x256xbf16>
    %cst_55 = arith.constant 0.000000e+00 : f32
    %54 = vector.broadcast %cst_55 : f32 to vector<8x256xf32>
    %c0_i32 = arith.constant 0 : i32
    %c7_i32 = arith.constant 7 : i32
    %55 = arith.subi %c7_i32, %c0_i32 : i32
    %56 = arith.index_cast %c0_i32 : i32 to index
    %c0_56 = arith.constant 0 : index
    %c0_57 = arith.constant 0 : index
    %57 = vector.load %arg9[%56, %c0_56, %c0_57] : memref<8x8x128xf32, #tpu.memory_space<vmem>>, vector<1x8x128xf32>
    %58 = vector.shape_cast %57 : vector<1x8x128xf32> to vector<8x128xf32>
    %59 = arith.index_cast %55 : i32 to index
    %c0_58 = arith.constant 0 : index
    %c0_59 = arith.constant 0 : index
    %60 = vector.load %arg10[%59, %c0_58, %c0_59] : memref<8x8x128xf32, #tpu.memory_space<vmem>>, vector<1x8x128xf32>
    %61 = vector.shape_cast %60 : vector<1x8x128xf32> to vector<8x128xf32>
    %62 = tpu.concatenate %58, %61 in 1 : vector<8x128xf32>, vector<8x128xf32> -> vector<8x256xf32>
    %63 = arith.truncf %54 : vector<8x256xf32> to vector<8x256xbf16>
    %cst_60 = arith.constant dense<0.000000e+00> : vector<8x256xf32>
    %64 = tpu.matmul %63, %53, %cst_60 {dimension_numbers = #tpu.dot_dimension_numbers<[1], [0], [0], [1], [0, 0, 1, 1], [], []>} : vector<8x256xbf16>, vector<256x256xbf16>, vector<8x256xf32> -> vector<8x256xf32>
    %65 = arith.addf %62, %64 : vector<8x256xf32>
    %66 = math.tanh %65 : vector<8x256xf32>
    %67 = vector.extract_strided_slice %66 {offsets = [0, 0], sizes = [8, 128], strides = [1, 1]} : vector<8x256xf32> to vector<8x128xf32>
    %68 = arith.index_cast %c0_i32 : i32 to index
    %c0_61 = arith.constant 0 : index
    %c0_62 = arith.constant 0 : index
    %69 = vector.load %arg9[%68, %c0_61, %c0_62] : memref<8x8x128xf32, #tpu.memory_space<vmem>>, vector<1x8x128xf32>
    %70 = vector.shape_cast %69 : vector<1x8x128xf32> to vector<8x128xf32>
    %71 = vector.shape_cast %67 : vector<8x128xf32> to vector<1x8x128xf32>
    tpu.vector_store %arg9[%68, %c0_61, %c0_62], %71 {strides = array<i32>} : memref<8x8x128xf32, #tpu.memory_space<vmem>>, vector<1x8x128xf32>,
    %72 = vector.extract_strided_slice %66 {offsets = [0, 128], sizes = [8, 128], strides = [1, 1]} : vector<8x256xf32> to vector<8x128xf32>
    %73 = arith.index_cast %55 : i32 to index
    %c0_63 = arith.constant 0 : index
    %c0_64 = arith.constant 0 : index
    %74 = vector.load %arg10[%73, %c0_63, %c0_64] : memref<8x8x128xf32, #tpu.memory_space<vmem>>, vector<1x8x128xf32>
    %75 = vector.shape_cast %74 : vector<1x8x128xf32> to vector<8x128xf32>
    %76 = vector.shape_cast %72 : vector<8x128xf32> to vector<1x8x128xf32>
    tpu.vector_store %arg10[%73, %c0_63, %c0_64], %76 {strides = array<i32>} : memref<8x8x128xf32, #tpu.memory_space<vmem>>, vector<1x8x128xf32>,
    %c1_i32 = arith.constant 1 : i32
    %c7_i32_65 = arith.constant 7 : i32
    %77 = arith.subi %c7_i32_65, %c1_i32 : i32
    %78 = arith.index_cast %c1_i32 : i32 to index
    %c0_66 = arith.constant 0 : index
    %c0_67 = arith.constant 0 : index
    %79 = vector.load %arg9[%78, %c0_66, %c0_67] : memref<8x8x128xf32, #tpu.memory_space<vmem>>, vector<1x8x128xf32>
    %80 = vector.shape_cast %79 : vector<1x8x128xf32> to vector<8x128xf32>
    %81 = arith.index_cast %77 : i32 to index
    %c0_68 = arith.constant 0 : index
    %c0_69 = arith.constant 0 : index
    %82 = vector.load %arg10[%81, %c0_68, %c0_69] : memref<8x8x128xf32, #tpu.memory_space<vmem>>, vector<1x8x128xf32>
    %83 = vector.shape_cast %82 : vector<1x8x128xf32> to vector<8x128xf32>
    %84 = tpu.concatenate %80, %83 in 1 : vector<8x128xf32>, vector<8x128xf32> -> vector<8x256xf32>
    %85 = arith.truncf %66 : vector<8x256xf32> to vector<8x256xbf16>
    %cst_70 = arith.constant dense<0.000000e+00> : vector<8x256xf32>
    %86 = tpu.matmul %85, %53, %cst_70 {dimension_numbers = #tpu.dot_dimension_numbers<[1], [0], [0], [1], [0, 0, 1, 1], [], []>} : vector<8x256xbf16>, vector<256x256xbf16>, vector<8x256xf32> -> vector<8x256xf32>
    %87 = arith.addf %84, %86 : vector<8x256xf32>
    %88 = math.tanh %87 : vector<8x256xf32>
    %89 = vector.extract_strided_slice %88 {offsets = [0, 0], sizes = [8, 128], strides = [1, 1]} : vector<8x256xf32> to vector<8x128xf32>
    %90 = arith.index_cast %c1_i32 : i32 to index
    %c0_71 = arith.constant 0 : index
    %c0_72 = arith.constant 0 : index
    %91 = vector.load %arg9[%90, %c0_71, %c0_72] : memref<8x8x128xf32, #tpu.memory_space<vmem>>, vector<1x8x128xf32>
    %92 = vector.shape_cast %91 : vector<1x8x128xf32> to vector<8x128xf32>
    %93 = vector.shape_cast %89 : vector<8x128xf32> to vector<1x8x128xf32>
    tpu.vector_store %arg9[%90, %c0_71, %c0_72], %93 {strides = array<i32>} : memref<8x8x128xf32, #tpu.memory_space<vmem>>, vector<1x8x128xf32>,
    %94 = vector.extract_strided_slice %88 {offsets = [0, 128], sizes = [8, 128], strides = [1, 1]} : vector<8x256xf32> to vector<8x128xf32>
    %95 = arith.index_cast %77 : i32 to index
    %c0_73 = arith.constant 0 : index
    %c0_74 = arith.constant 0 : index
    %96 = vector.load %arg10[%95, %c0_73, %c0_74] : memref<8x8x128xf32, #tpu.memory_space<vmem>>, vector<1x8x128xf32>
    %97 = vector.shape_cast %96 : vector<1x8x128xf32> to vector<8x128xf32>
    %98 = vector.shape_cast %94 : vector<8x128xf32> to vector<1x8x128xf32>
    tpu.vector_store %arg10[%95, %c0_73, %c0_74], %98 {strides = array<i32>} : memref<8x8x128xf32, #tpu.memory_space<vmem>>, vector<1x8x128xf32>,
    %c2_i32 = arith.constant 2 : i32
    %c7_i32_75 = arith.constant 7 : i32
    %99 = arith.subi %c7_i32_75, %c2_i32 : i32
    %100 = arith.index_cast %c2_i32 : i32 to index
    %c0_76 = arith.constant 0 : index
    %c0_77 = arith.constant 0 : index
    %101 = vector.load %arg9[%100, %c0_76, %c0_77] : memref<8x8x128xf32, #tpu.memory_space<vmem>>, vector<1x8x128xf32>
    %102 = vector.shape_cast %101 : vector<1x8x128xf32> to vector<8x128xf32>
    %103 = arith.index_cast %99 : i32 to index
    %c0_78 = arith.constant 0 : index
    %c0_79 = arith.constant 0 : index
    %104 = vector.load %arg10[%103, %c0_78, %c0_79] : memref<8x8x128xf32, #tpu.memory_space<vmem>>, vector<1x8x128xf32>
    %105 = vector.shape_cast %104 : vector<1x8x128xf32> to vector<8x128xf32>
    %106 = tpu.concatenate %102, %105 in 1 : vector<8x128xf32>, vector<8x128xf32> -> vector<8x256xf32>
    %107 = arith.truncf %88 : vector<8x256xf32> to vector<8x256xbf16>
    %cst_80 = arith.constant dense<0.000000e+00> : vector<8x256xf32>
    %108 = tpu.matmul %107, %53, %cst_80 {dimension_numbers = #tpu.dot_dimension_numbers<[1], [0], [0], [1], [0, 0, 1, 1], [], []>} : vector<8x256xbf16>, vector<256x256xbf16>, vector<8x256xf32> -> vector<8x256xf32>
    %109 = arith.addf %106, %108 : vector<8x256xf32>
    %110 = math.tanh %109 : vector<8x256xf32>
    %111 = vector.extract_strided_slice %110 {offsets = [0, 0], sizes = [8, 128], strides = [1, 1]} : vector<8x256xf32> to vector<8x128xf32>
    %112 = arith.index_cast %c2_i32 : i32 to index
    %c0_81 = arith.constant 0 : index
    %c0_82 = arith.constant 0 : index
    %113 = vector.load %arg9[%112, %c0_81, %c0_82] : memref<8x8x128xf32, #tpu.memory_space<vmem>>, vector<1x8x128xf32>
    %114 = vector.shape_cast %113 : vector<1x8x128xf32> to vector<8x128xf32>
    %115 = vector.shape_cast %111 : vector<8x128xf32> to vector<1x8x128xf32>
    tpu.vector_store %arg9[%112, %c0_81, %c0_82], %115 {strides = array<i32>} : memref<8x8x128xf32, #tpu.memory_space<vmem>>, vector<1x8x128xf32>,
    %116 = vector.extract_strided_slice %110 {offsets = [0, 128], sizes = [8, 128], strides = [1, 1]} : vector<8x256xf32> to vector<8x128xf32>
    %117 = arith.index_cast %99 : i32 to index
    %c0_83 = arith.constant 0 : index
    %c0_84 = arith.constant 0 : index
    %118 = vector.load %arg10[%117, %c0_83, %c0_84] : memref<8x8x128xf32, #tpu.memory_space<vmem>>, vector<1x8x128xf32>
    %119 = vector.shape_cast %118 : vector<1x8x128xf32> to vector<8x128xf32>
    %120 = vector.shape_cast %116 : vector<8x128xf32> to vector<1x8x128xf32>
    tpu.vector_store %arg10[%117, %c0_83, %c0_84], %120 {strides = array<i32>} : memref<8x8x128xf32, #tpu.memory_space<vmem>>, vector<1x8x128xf32>,
    %c3_i32 = arith.constant 3 : i32
    %c7_i32_85 = arith.constant 7 : i32
    %121 = arith.subi %c7_i32_85, %c3_i32 : i32
    %122 = arith.index_cast %c3_i32 : i32 to index
    %c0_86 = arith.constant 0 : index
    %c0_87 = arith.constant 0 : index
    %123 = vector.load %arg9[%122, %c0_86, %c0_87] : memref<8x8x128xf32, #tpu.memory_space<vmem>>, vector<1x8x128xf32>
    %124 = vector.shape_cast %123 : vector<1x8x128xf32> to vector<8x128xf32>
    %125 = arith.index_cast %121 : i32 to index
    %c0_88 = arith.constant 0 : index
    %c0_89 = arith.constant 0 : index
    %126 = vector.load %arg10[%125, %c0_88, %c0_89] : memref<8x8x128xf32, #tpu.memory_space<vmem>>, vector<1x8x128xf32>
    %127 = vector.shape_cast %126 : vector<1x8x128xf32> to vector<8x128xf32>
    %128 = tpu.concatenate %124, %127 in 1 : vector<8x128xf32>, vector<8x128xf32> -> vector<8x256xf32>
    %129 = arith.truncf %110 : vector<8x256xf32> to vector<8x256xbf16>
    %cst_90 = arith.constant dense<0.000000e+00> : vector<8x256xf32>
    %130 = tpu.matmul %129, %53, %cst_90 {dimension_numbers = #tpu.dot_dimension_numbers<[1], [0], [0], [1], [0, 0, 1, 1], [], []>} : vector<8x256xbf16>, vector<256x256xbf16>, vector<8x256xf32> -> vector<8x256xf32>
    %131 = arith.addf %128, %130 : vector<8x256xf32>
    %132 = math.tanh %131 : vector<8x256xf32>
    %133 = vector.extract_strided_slice %132 {offsets = [0, 0], sizes = [8, 128], strides = [1, 1]} : vector<8x256xf32> to vector<8x128xf32>
    %134 = arith.index_cast %c3_i32 : i32 to index
    %c0_91 = arith.constant 0 : index
    %c0_92 = arith.constant 0 : index
    %135 = vector.load %arg9[%134, %c0_91, %c0_92] : memref<8x8x128xf32, #tpu.memory_space<vmem>>, vector<1x8x128xf32>
    %136 = vector.shape_cast %135 : vector<1x8x128xf32> to vector<8x128xf32>
    %137 = vector.shape_cast %133 : vector<8x128xf32> to vector<1x8x128xf32>
    tpu.vector_store %arg9[%134, %c0_91, %c0_92], %137 {strides = array<i32>} : memref<8x8x128xf32, #tpu.memory_space<vmem>>, vector<1x8x128xf32>,
    %138 = vector.extract_strided_slice %132 {offsets = [0, 128], sizes = [8, 128], strides = [1, 1]} : vector<8x256xf32> to vector<8x128xf32>
    %139 = arith.index_cast %121 : i32 to index
    %c0_93 = arith.constant 0 : index
    %c0_94 = arith.constant 0 : index
    %140 = vector.load %arg10[%139, %c0_93, %c0_94] : memref<8x8x128xf32, #tpu.memory_space<vmem>>, vector<1x8x128xf32>
    %141 = vector.shape_cast %140 : vector<1x8x128xf32> to vector<8x128xf32>
    %142 = vector.shape_cast %138 : vector<8x128xf32> to vector<1x8x128xf32>
    tpu.vector_store %arg10[%139, %c0_93, %c0_94], %142 {strides = array<i32>} : memref<8x8x128xf32, #tpu.memory_space<vmem>>, vector<1x8x128xf32>,
    %c4_i32 = arith.constant 4 : i32
    %c7_i32_95 = arith.constant 7 : i32
    %143 = arith.subi %c7_i32_95, %c4_i32 : i32
    %144 = arith.index_cast %c4_i32 : i32 to index
    %c0_96 = arith.constant 0 : index
    %c0_97 = arith.constant 0 : index
    %145 = vector.load %arg9[%144, %c0_96, %c0_97] : memref<8x8x128xf32, #tpu.memory_space<vmem>>, vector<1x8x128xf32>
    %146 = vector.shape_cast %145 : vector<1x8x128xf32> to vector<8x128xf32>
    %147 = arith.index_cast %143 : i32 to index
    %c0_98 = arith.constant 0 : index
    %c0_99 = arith.constant 0 : index
    %148 = vector.load %arg10[%147, %c0_98, %c0_99] : memref<8x8x128xf32, #tpu.memory_space<vmem>>, vector<1x8x128xf32>
    %149 = vector.shape_cast %148 : vector<1x8x128xf32> to vector<8x128xf32>
    %150 = tpu.concatenate %146, %149 in 1 : vector<8x128xf32>, vector<8x128xf32> -> vector<8x256xf32>
    %151 = arith.truncf %132 : vector<8x256xf32> to vector<8x256xbf16>
    %cst_100 = arith.constant dense<0.000000e+00> : vector<8x256xf32>
    %152 = tpu.matmul %151, %53, %cst_100 {dimension_numbers = #tpu.dot_dimension_numbers<[1], [0], [0], [1], [0, 0, 1, 1], [], []>} : vector<8x256xbf16>, vector<256x256xbf16>, vector<8x256xf32> -> vector<8x256xf32>
    %153 = arith.addf %150, %152 : vector<8x256xf32>
    %154 = math.tanh %153 : vector<8x256xf32>
    %155 = vector.extract_strided_slice %154 {offsets = [0, 0], sizes = [8, 128], strides = [1, 1]} : vector<8x256xf32> to vector<8x128xf32>
    %156 = arith.index_cast %c4_i32 : i32 to index
    %c0_101 = arith.constant 0 : index
    %c0_102 = arith.constant 0 : index
    %157 = vector.load %arg9[%156, %c0_101, %c0_102] : memref<8x8x128xf32, #tpu.memory_space<vmem>>, vector<1x8x128xf32>
    %158 = vector.shape_cast %157 : vector<1x8x128xf32> to vector<8x128xf32>
    %159 = vector.shape_cast %155 : vector<8x128xf32> to vector<1x8x128xf32>
    tpu.vector_store %arg9[%156, %c0_101, %c0_102], %159 {strides = array<i32>} : memref<8x8x128xf32, #tpu.memory_space<vmem>>, vector<1x8x128xf32>,
    %160 = vector.extract_strided_slice %154 {offsets = [0, 128], sizes = [8, 128], strides = [1, 1]} : vector<8x256xf32> to vector<8x128xf32>
    %161 = arith.index_cast %143 : i32 to index
    %c0_103 = arith.constant 0 : index
    %c0_104 = arith.constant 0 : index
    %162 = vector.load %arg10[%161, %c0_103, %c0_104] : memref<8x8x128xf32, #tpu.memory_space<vmem>>, vector<1x8x128xf32>
    %163 = vector.shape_cast %162 : vector<1x8x128xf32> to vector<8x128xf32>
    %164 = vector.shape_cast %160 : vector<8x128xf32> to vector<1x8x128xf32>
    tpu.vector_store %arg10[%161, %c0_103, %c0_104], %164 {strides = array<i32>} : memref<8x8x128xf32, #tpu.memory_space<vmem>>, vector<1x8x128xf32>,
    %c5_i32 = arith.constant 5 : i32
    %c7_i32_105 = arith.constant 7 : i32
    %165 = arith.subi %c7_i32_105, %c5_i32 : i32
    %166 = arith.index_cast %c5_i32 : i32 to index
    %c0_106 = arith.constant 0 : index
    %c0_107 = arith.constant 0 : index
    %167 = vector.load %arg9[%166, %c0_106, %c0_107] : memref<8x8x128xf32, #tpu.memory_space<vmem>>, vector<1x8x128xf32>
    %168 = vector.shape_cast %167 : vector<1x8x128xf32> to vector<8x128xf32>
    %169 = arith.index_cast %165 : i32 to index
    %c0_108 = arith.constant 0 : index
    %c0_109 = arith.constant 0 : index
    %170 = vector.load %arg10[%169, %c0_108, %c0_109] : memref<8x8x128xf32, #tpu.memory_space<vmem>>, vector<1x8x128xf32>
    %171 = vector.shape_cast %170 : vector<1x8x128xf32> to vector<8x128xf32>
    %172 = tpu.concatenate %168, %171 in 1 : vector<8x128xf32>, vector<8x128xf32> -> vector<8x256xf32>
    %173 = arith.truncf %154 : vector<8x256xf32> to vector<8x256xbf16>
    %cst_110 = arith.constant dense<0.000000e+00> : vector<8x256xf32>
    %174 = tpu.matmul %173, %53, %cst_110 {dimension_numbers = #tpu.dot_dimension_numbers<[1], [0], [0], [1], [0, 0, 1, 1], [], []>} : vector<8x256xbf16>, vector<256x256xbf16>, vector<8x256xf32> -> vector<8x256xf32>
    %175 = arith.addf %172, %174 : vector<8x256xf32>
    %176 = math.tanh %175 : vector<8x256xf32>
    %177 = vector.extract_strided_slice %176 {offsets = [0, 0], sizes = [8, 128], strides = [1, 1]} : vector<8x256xf32> to vector<8x128xf32>
    %178 = arith.index_cast %c5_i32 : i32 to index
    %c0_111 = arith.constant 0 : index
    %c0_112 = arith.constant 0 : index
    %179 = vector.load %arg9[%178, %c0_111, %c0_112] : memref<8x8x128xf32, #tpu.memory_space<vmem>>, vector<1x8x128xf32>
    %180 = vector.shape_cast %179 : vector<1x8x128xf32> to vector<8x128xf32>
    %181 = vector.shape_cast %177 : vector<8x128xf32> to vector<1x8x128xf32>
    tpu.vector_store %arg9[%178, %c0_111, %c0_112], %181 {strides = array<i32>} : memref<8x8x128xf32, #tpu.memory_space<vmem>>, vector<1x8x128xf32>,
    %182 = vector.extract_strided_slice %176 {offsets = [0, 128], sizes = [8, 128], strides = [1, 1]} : vector<8x256xf32> to vector<8x128xf32>
    %183 = arith.index_cast %165 : i32 to index
    %c0_113 = arith.constant 0 : index
    %c0_114 = arith.constant 0 : index
    %184 = vector.load %arg10[%183, %c0_113, %c0_114] : memref<8x8x128xf32, #tpu.memory_space<vmem>>, vector<1x8x128xf32>
    %185 = vector.shape_cast %184 : vector<1x8x128xf32> to vector<8x128xf32>
    %186 = vector.shape_cast %182 : vector<8x128xf32> to vector<1x8x128xf32>
    tpu.vector_store %arg10[%183, %c0_113, %c0_114], %186 {strides = array<i32>} : memref<8x8x128xf32, #tpu.memory_space<vmem>>, vector<1x8x128xf32>,
    %c6_i32 = arith.constant 6 : i32
    %c7_i32_115 = arith.constant 7 : i32
    %187 = arith.subi %c7_i32_115, %c6_i32 : i32
    %188 = arith.index_cast %c6_i32 : i32 to index
    %c0_116 = arith.constant 0 : index
    %c0_117 = arith.constant 0 : index
    %189 = vector.load %arg9[%188, %c0_116, %c0_117] : memref<8x8x128xf32, #tpu.memory_space<vmem>>, vector<1x8x128xf32>
    %190 = vector.shape_cast %189 : vector<1x8x128xf32> to vector<8x128xf32>
    %191 = arith.index_cast %187 : i32 to index
    %c0_118 = arith.constant 0 : index
    %c0_119 = arith.constant 0 : index
    %192 = vector.load %arg10[%191, %c0_118, %c0_119] : memref<8x8x128xf32, #tpu.memory_space<vmem>>, vector<1x8x128xf32>
    %193 = vector.shape_cast %192 : vector<1x8x128xf32> to vector<8x128xf32>
    %194 = tpu.concatenate %190, %193 in 1 : vector<8x128xf32>, vector<8x128xf32> -> vector<8x256xf32>
    %195 = arith.truncf %176 : vector<8x256xf32> to vector<8x256xbf16>
    %cst_120 = arith.constant dense<0.000000e+00> : vector<8x256xf32>
    %196 = tpu.matmul %195, %53, %cst_120 {dimension_numbers = #tpu.dot_dimension_numbers<[1], [0], [0], [1], [0, 0, 1, 1], [], []>} : vector<8x256xbf16>, vector<256x256xbf16>, vector<8x256xf32> -> vector<8x256xf32>
    %197 = arith.addf %194, %196 : vector<8x256xf32>
    %198 = math.tanh %197 : vector<8x256xf32>
    %199 = vector.extract_strided_slice %198 {offsets = [0, 0], sizes = [8, 128], strides = [1, 1]} : vector<8x256xf32> to vector<8x128xf32>
    %200 = arith.index_cast %c6_i32 : i32 to index
    %c0_121 = arith.constant 0 : index
    %c0_122 = arith.constant 0 : index
    %201 = vector.load %arg9[%200, %c0_121, %c0_122] : memref<8x8x128xf32, #tpu.memory_space<vmem>>, vector<1x8x128xf32>
    %202 = vector.shape_cast %201 : vector<1x8x128xf32> to vector<8x128xf32>
    %203 = vector.shape_cast %199 : vector<8x128xf32> to vector<1x8x128xf32>
    tpu.vector_store %arg9[%200, %c0_121, %c0_122], %203 {strides = array<i32>} : memref<8x8x128xf32, #tpu.memory_space<vmem>>, vector<1x8x128xf32>,
    %204 = vector.extract_strided_slice %198 {offsets = [0, 128], sizes = [8, 128], strides = [1, 1]} : vector<8x256xf32> to vector<8x128xf32>
    %205 = arith.index_cast %187 : i32 to index
    %c0_123 = arith.constant 0 : index
    %c0_124 = arith.constant 0 : index
    %206 = vector.load %arg10[%205, %c0_123, %c0_124] : memref<8x8x128xf32, #tpu.memory_space<vmem>>, vector<1x8x128xf32>
    %207 = vector.shape_cast %206 : vector<1x8x128xf32> to vector<8x128xf32>
    %208 = vector.shape_cast %204 : vector<8x128xf32> to vector<1x8x128xf32>
    tpu.vector_store %arg10[%205, %c0_123, %c0_124], %208 {strides = array<i32>} : memref<8x8x128xf32, #tpu.memory_space<vmem>>, vector<1x8x128xf32>,
    %c7_i32_125 = arith.constant 7 : i32
    %c7_i32_126 = arith.constant 7 : i32
    %209 = arith.subi %c7_i32_126, %c7_i32_125 : i32
    %210 = arith.index_cast %c7_i32_125 : i32 to index
    %c0_127 = arith.constant 0 : index
    %c0_128 = arith.constant 0 : index
    %211 = vector.load %arg9[%210, %c0_127, %c0_128] : memref<8x8x128xf32, #tpu.memory_space<vmem>>, vector<1x8x128xf32>
    %212 = vector.shape_cast %211 : vector<1x8x128xf32> to vector<8x128xf32>
    %213 = arith.index_cast %209 : i32 to index
    %c0_129 = arith.constant 0 : index
    %c0_130 = arith.constant 0 : index
    %214 = vector.load %arg10[%213, %c0_129, %c0_130] : memref<8x8x128xf32, #tpu.memory_space<vmem>>, vector<1x8x128xf32>
    %215 = vector.shape_cast %214 : vector<1x8x128xf32> to vector<8x128xf32>
    %216 = tpu.concatenate %212, %215 in 1 : vector<8x128xf32>, vector<8x128xf32> -> vector<8x256xf32>
    %217 = arith.truncf %198 : vector<8x256xf32> to vector<8x256xbf16>
    %cst_131 = arith.constant dense<0.000000e+00> : vector<8x256xf32>
    %218 = tpu.matmul %217, %53, %cst_131 {dimension_numbers = #tpu.dot_dimension_numbers<[1], [0], [0], [1], [0, 0, 1, 1], [], []>} : vector<8x256xbf16>, vector<256x256xbf16>, vector<8x256xf32> -> vector<8x256xf32>
    %219 = arith.addf %216, %218 : vector<8x256xf32>
    %220 = math.tanh %219 : vector<8x256xf32>
    %221 = vector.extract_strided_slice %220 {offsets = [0, 0], sizes = [8, 128], strides = [1, 1]} : vector<8x256xf32> to vector<8x128xf32>
    %222 = arith.index_cast %c7_i32_125 : i32 to index
    %c0_132 = arith.constant 0 : index
    %c0_133 = arith.constant 0 : index
    %223 = vector.load %arg9[%222, %c0_132, %c0_133] : memref<8x8x128xf32, #tpu.memory_space<vmem>>, vector<1x8x128xf32>
    %224 = vector.shape_cast %223 : vector<1x8x128xf32> to vector<8x128xf32>
    %225 = vector.shape_cast %221 : vector<8x128xf32> to vector<1x8x128xf32>
    tpu.vector_store %arg9[%222, %c0_132, %c0_133], %225 {strides = array<i32>} : memref<8x8x128xf32, #tpu.memory_space<vmem>>, vector<1x8x128xf32>,
    %226 = vector.extract_strided_slice %220 {offsets = [0, 128], sizes = [8, 128], strides = [1, 1]} : vector<8x256xf32> to vector<8x128xf32>
    %227 = arith.index_cast %209 : i32 to index
    %c0_134 = arith.constant 0 : index
    %c0_135 = arith.constant 0 : index
    %228 = vector.load %arg10[%227, %c0_134, %c0_135] : memref<8x8x128xf32, #tpu.memory_space<vmem>>, vector<1x8x128xf32>
    %229 = vector.shape_cast %228 : vector<1x8x128xf32> to vector<8x128xf32>
    %230 = vector.shape_cast %226 : vector<8x128xf32> to vector<1x8x128xf32>
    tpu.vector_store %arg10[%227, %c0_134, %c0_135], %230 {strides = array<i32>} : memref<8x8x128xf32, #tpu.memory_space<vmem>>, vector<1x8x128xf32>,
    %c8_i32 = arith.constant 8 : i32
    %c0_136 = arith.constant 0 : index
    %c0_137 = arith.constant 0 : index
    %231 = vector.load %arg5[%c0_136, %c0_137] : memref<256x128xbf16, #tpu.memory_space<vmem>>, vector<256x128xbf16>
    %c0_138 = arith.constant 0 : index
    %c0_139 = arith.constant 0 : index
    %232 = vector.load %arg6[%c0_138, %c0_139] : memref<1x128xf32, #tpu.memory_space<vmem>>, vector<1x128xf32>
    %c0_140 = arith.constant 0 : index
    %c0_141 = arith.constant 0 : index
    %c0_142 = arith.constant 0 : index
    %233 = vector.load %arg9[%c0_140, %c0_141, %c0_142] : memref<8x8x128xf32, #tpu.memory_space<vmem>>, vector<1x8x128xf32>
    %234 = vector.shape_cast %233 : vector<1x8x128xf32> to vector<8x128xf32>
    %c0_143 = arith.constant 0 : index
    %c0_144 = arith.constant 0 : index
    %c0_145 = arith.constant 0 : index
    %235 = vector.load %arg10[%c0_143, %c0_144, %c0_145] : memref<8x8x128xf32, #tpu.memory_space<vmem>>, vector<1x8x128xf32>
    %236 = vector.shape_cast %235 : vector<1x8x128xf32> to vector<8x128xf32>
    %237 = tpu.concatenate %234, %236 in 1 : vector<8x128xf32>, vector<8x128xf32> -> vector<8x256xf32>
    %238 = arith.truncf %237 : vector<8x256xf32> to vector<8x256xbf16>
    %cst_146 = arith.constant dense<0.000000e+00> : vector<8x128xf32>
    %239 = tpu.matmul %238, %231, %cst_146 {dimension_numbers = #tpu.dot_dimension_numbers<[1], [0], [0], [1], [0, 0, 1, 1], [], []>} : vector<8x256xbf16>, vector<256x128xbf16>, vector<8x128xf32> -> vector<8x128xf32>
    %240 = vector.broadcast %232 : vector<1x128xf32> to vector<8x128xf32>
    %241 = arith.addf %239, %240 : vector<8x128xf32>
    %c0_147 = arith.constant 0 : index
    %c0_148 = arith.constant 0 : index
    %c0_149 = arith.constant 0 : index
    %242 = vector.load %arg7[%c0_147, %c0_148, %c0_149] : memref<8x8x128xf32, #tpu.memory_space<vmem>>, vector<8x1x128xf32>
    %243 = vector.shape_cast %242 : vector<8x1x128xf32> to vector<8x128xf32>
    %244 = vector.shape_cast %241 : vector<8x128xf32> to vector<8x1x128xf32>
    tpu.vector_store %arg7[%c0_147, %c0_148, %c0_149], %244 {strides = array<i32>} : memref<8x8x128xf32, #tpu.memory_space<vmem>>, vector<8x1x128xf32>,
    %c1_150 = arith.constant 1 : index
    %c0_151 = arith.constant 0 : index
    %c0_152 = arith.constant 0 : index
    %245 = vector.load %arg9[%c1_150, %c0_151, %c0_152] : memref<8x8x128xf32, #tpu.memory_space<vmem>>, vector<1x8x128xf32>
    %246 = vector.shape_cast %245 : vector<1x8x128xf32> to vector<8x128xf32>
    %c1_153 = arith.constant 1 : index
    %c0_154 = arith.constant 0 : index
    %c0_155 = arith.constant 0 : index
    %247 = vector.load %arg10[%c1_153, %c0_154, %c0_155] : memref<8x8x128xf32, #tpu.memory_space<vmem>>, vector<1x8x128xf32>
    %248 = vector.shape_cast %247 : vector<1x8x128xf32> to vector<8x128xf32>
    %249 = tpu.concatenate %246, %248 in 1 : vector<8x128xf32>, vector<8x128xf32> -> vector<8x256xf32>
    %250 = arith.truncf %249 : vector<8x256xf32> to vector<8x256xbf16>
    %cst_156 = arith.constant dense<0.000000e+00> : vector<8x128xf32>
    %251 = tpu.matmul %250, %231, %cst_156 {dimension_numbers = #tpu.dot_dimension_numbers<[1], [0], [0], [1], [0, 0, 1, 1], [], []>} : vector<8x256xbf16>, vector<256x128xbf16>, vector<8x128xf32> -> vector<8x128xf32>
    %252 = vector.broadcast %232 : vector<1x128xf32> to vector<8x128xf32>
    %253 = arith.addf %251, %252 : vector<8x128xf32>
    %c0_157 = arith.constant 0 : index
    %c1_158 = arith.constant 1 : index
    %c0_159 = arith.constant 0 : index
    %254 = vector.load %arg7[%c0_157, %c1_158, %c0_159] : memref<8x8x128xf32, #tpu.memory_space<vmem>>, vector<8x1x128xf32>
    %255 = vector.shape_cast %254 : vector<8x1x128xf32> to vector<8x128xf32>
    %256 = vector.shape_cast %253 : vector<8x128xf32> to vector<8x1x128xf32>
    tpu.vector_store %arg7[%c0_157, %c1_158, %c0_159], %256 {strides = array<i32>} : memref<8x8x128xf32, #tpu.memory_space<vmem>>, vector<8x1x128xf32>,
    %c2_160 = arith.constant 2 : index
    %c0_161 = arith.constant 0 : index
    %c0_162 = arith.constant 0 : index
    %257 = vector.load %arg9[%c2_160, %c0_161, %c0_162] : memref<8x8x128xf32, #tpu.memory_space<vmem>>, vector<1x8x128xf32>
    %258 = vector.shape_cast %257 : vector<1x8x128xf32> to vector<8x128xf32>
    %c2_163 = arith.constant 2 : index
    %c0_164 = arith.constant 0 : index
    %c0_165 = arith.constant 0 : index
    %259 = vector.load %arg10[%c2_163, %c0_164, %c0_165] : memref<8x8x128xf32, #tpu.memory_space<vmem>>, vector<1x8x128xf32>
    %260 = vector.shape_cast %259 : vector<1x8x128xf32> to vector<8x128xf32>
    %261 = tpu.concatenate %258, %260 in 1 : vector<8x128xf32>, vector<8x128xf32> -> vector<8x256xf32>
    %262 = arith.truncf %261 : vector<8x256xf32> to vector<8x256xbf16>
    %cst_166 = arith.constant dense<0.000000e+00> : vector<8x128xf32>
    %263 = tpu.matmul %262, %231, %cst_166 {dimension_numbers = #tpu.dot_dimension_numbers<[1], [0], [0], [1], [0, 0, 1, 1], [], []>} : vector<8x256xbf16>, vector<256x128xbf16>, vector<8x128xf32> -> vector<8x128xf32>
    %264 = vector.broadcast %232 : vector<1x128xf32> to vector<8x128xf32>
    %265 = arith.addf %263, %264 : vector<8x128xf32>
    %c0_167 = arith.constant 0 : index
    %c2_168 = arith.constant 2 : index
    %c0_169 = arith.constant 0 : index
    %266 = vector.load %arg7[%c0_167, %c2_168, %c0_169] : memref<8x8x128xf32, #tpu.memory_space<vmem>>, vector<8x1x128xf32>
    %267 = vector.shape_cast %266 : vector<8x1x128xf32> to vector<8x128xf32>
    %268 = vector.shape_cast %265 : vector<8x128xf32> to vector<8x1x128xf32>
    tpu.vector_store %arg7[%c0_167, %c2_168, %c0_169], %268 {strides = array<i32>} : memref<8x8x128xf32, #tpu.memory_space<vmem>>, vector<8x1x128xf32>,
    %c3_170 = arith.constant 3 : index
    %c0_171 = arith.constant 0 : index
    %c0_172 = arith.constant 0 : index
    %269 = vector.load %arg9[%c3_170, %c0_171, %c0_172] : memref<8x8x128xf32, #tpu.memory_space<vmem>>, vector<1x8x128xf32>
    %270 = vector.shape_cast %269 : vector<1x8x128xf32> to vector<8x128xf32>
    %c3_173 = arith.constant 3 : index
    %c0_174 = arith.constant 0 : index
    %c0_175 = arith.constant 0 : index
    %271 = vector.load %arg10[%c3_173, %c0_174, %c0_175] : memref<8x8x128xf32, #tpu.memory_space<vmem>>, vector<1x8x128xf32>
    %272 = vector.shape_cast %271 : vector<1x8x128xf32> to vector<8x128xf32>
    %273 = tpu.concatenate %270, %272 in 1 : vector<8x128xf32>, vector<8x128xf32> -> vector<8x256xf32>
    %274 = arith.truncf %273 : vector<8x256xf32> to vector<8x256xbf16>
    %cst_176 = arith.constant dense<0.000000e+00> : vector<8x128xf32>
    %275 = tpu.matmul %274, %231, %cst_176 {dimension_numbers = #tpu.dot_dimension_numbers<[1], [0], [0], [1], [0, 0, 1, 1], [], []>} : vector<8x256xbf16>, vector<256x128xbf16>, vector<8x128xf32> -> vector<8x128xf32>
    %276 = vector.broadcast %232 : vector<1x128xf32> to vector<8x128xf32>
    %277 = arith.addf %275, %276 : vector<8x128xf32>
    %c0_177 = arith.constant 0 : index
    %c3_178 = arith.constant 3 : index
    %c0_179 = arith.constant 0 : index
    %278 = vector.load %arg7[%c0_177, %c3_178, %c0_179] : memref<8x8x128xf32, #tpu.memory_space<vmem>>, vector<8x1x128xf32>
    %279 = vector.shape_cast %278 : vector<8x1x128xf32> to vector<8x128xf32>
    %280 = vector.shape_cast %277 : vector<8x128xf32> to vector<8x1x128xf32>
    tpu.vector_store %arg7[%c0_177, %c3_178, %c0_179], %280 {strides = array<i32>} : memref<8x8x128xf32, #tpu.memory_space<vmem>>, vector<8x1x128xf32>,
    %c4_180 = arith.constant 4 : index
    %c0_181 = arith.constant 0 : index
    %c0_182 = arith.constant 0 : index
    %281 = vector.load %arg9[%c4_180, %c0_181, %c0_182] : memref<8x8x128xf32, #tpu.memory_space<vmem>>, vector<1x8x128xf32>
    %282 = vector.shape_cast %281 : vector<1x8x128xf32> to vector<8x128xf32>
    %c4_183 = arith.constant 4 : index
    %c0_184 = arith.constant 0 : index
    %c0_185 = arith.constant 0 : index
    %283 = vector.load %arg10[%c4_183, %c0_184, %c0_185] : memref<8x8x128xf32, #tpu.memory_space<vmem>>, vector<1x8x128xf32>
    %284 = vector.shape_cast %283 : vector<1x8x128xf32> to vector<8x128xf32>
    %285 = tpu.concatenate %282, %284 in 1 : vector<8x128xf32>, vector<8x128xf32> -> vector<8x256xf32>
    %286 = arith.truncf %285 : vector<8x256xf32> to vector<8x256xbf16>
    %cst_186 = arith.constant dense<0.000000e+00> : vector<8x128xf32>
    %287 = tpu.matmul %286, %231, %cst_186 {dimension_numbers = #tpu.dot_dimension_numbers<[1], [0], [0], [1], [0, 0, 1, 1], [], []>} : vector<8x256xbf16>, vector<256x128xbf16>, vector<8x128xf32> -> vector<8x128xf32>
    %288 = vector.broadcast %232 : vector<1x128xf32> to vector<8x128xf32>
    %289 = arith.addf %287, %288 : vector<8x128xf32>
    %c0_187 = arith.constant 0 : index
    %c4_188 = arith.constant 4 : index
    %c0_189 = arith.constant 0 : index
    %290 = vector.load %arg7[%c0_187, %c4_188, %c0_189] : memref<8x8x128xf32, #tpu.memory_space<vmem>>, vector<8x1x128xf32>
    %291 = vector.shape_cast %290 : vector<8x1x128xf32> to vector<8x128xf32>
    %292 = vector.shape_cast %289 : vector<8x128xf32> to vector<8x1x128xf32>
    tpu.vector_store %arg7[%c0_187, %c4_188, %c0_189], %292 {strides = array<i32>} : memref<8x8x128xf32, #tpu.memory_space<vmem>>, vector<8x1x128xf32>,
    %c5_190 = arith.constant 5 : index
    %c0_191 = arith.constant 0 : index
    %c0_192 = arith.constant 0 : index
    %293 = vector.load %arg9[%c5_190, %c0_191, %c0_192] : memref<8x8x128xf32, #tpu.memory_space<vmem>>, vector<1x8x128xf32>
    %294 = vector.shape_cast %293 : vector<1x8x128xf32> to vector<8x128xf32>
    %c5_193 = arith.constant 5 : index
    %c0_194 = arith.constant 0 : index
    %c0_195 = arith.constant 0 : index
    %295 = vector.load %arg10[%c5_193, %c0_194, %c0_195] : memref<8x8x128xf32, #tpu.memory_space<vmem>>, vector<1x8x128xf32>
    %296 = vector.shape_cast %295 : vector<1x8x128xf32> to vector<8x128xf32>
    %297 = tpu.concatenate %294, %296 in 1 : vector<8x128xf32>, vector<8x128xf32> -> vector<8x256xf32>
    %298 = arith.truncf %297 : vector<8x256xf32> to vector<8x256xbf16>
    %cst_196 = arith.constant dense<0.000000e+00> : vector<8x128xf32>
    %299 = tpu.matmul %298, %231, %cst_196 {dimension_numbers = #tpu.dot_dimension_numbers<[1], [0], [0], [1], [0, 0, 1, 1], [], []>} : vector<8x256xbf16>, vector<256x128xbf16>, vector<8x128xf32> -> vector<8x128xf32>
    %300 = vector.broadcast %232 : vector<1x128xf32> to vector<8x128xf32>
    %301 = arith.addf %299, %300 : vector<8x128xf32>
    %c0_197 = arith.constant 0 : index
    %c5_198 = arith.constant 5 : index
    %c0_199 = arith.constant 0 : index
    %302 = vector.load %arg7[%c0_197, %c5_198, %c0_199] : memref<8x8x128xf32, #tpu.memory_space<vmem>>, vector<8x1x128xf32>
    %303 = vector.shape_cast %302 : vector<8x1x128xf32> to vector<8x128xf32>
    %304 = vector.shape_cast %301 : vector<8x128xf32> to vector<8x1x128xf32>
    tpu.vector_store %arg7[%c0_197, %c5_198, %c0_199], %304 {strides = array<i32>} : memref<8x8x128xf32, #tpu.memory_space<vmem>>, vector<8x1x128xf32>,
    %c6_200 = arith.constant 6 : index
    %c0_201 = arith.constant 0 : index
    %c0_202 = arith.constant 0 : index
    %305 = vector.load %arg9[%c6_200, %c0_201, %c0_202] : memref<8x8x128xf32, #tpu.memory_space<vmem>>, vector<1x8x128xf32>
    %306 = vector.shape_cast %305 : vector<1x8x128xf32> to vector<8x128xf32>
    %c6_203 = arith.constant 6 : index
    %c0_204 = arith.constant 0 : index
    %c0_205 = arith.constant 0 : index
    %307 = vector.load %arg10[%c6_203, %c0_204, %c0_205] : memref<8x8x128xf32, #tpu.memory_space<vmem>>, vector<1x8x128xf32>
    %308 = vector.shape_cast %307 : vector<1x8x128xf32> to vector<8x128xf32>
    %309 = tpu.concatenate %306, %308 in 1 : vector<8x128xf32>, vector<8x128xf32> -> vector<8x256xf32>
    %310 = arith.truncf %309 : vector<8x256xf32> to vector<8x256xbf16>
    %cst_206 = arith.constant dense<0.000000e+00> : vector<8x128xf32>
    %311 = tpu.matmul %310, %231, %cst_206 {dimension_numbers = #tpu.dot_dimension_numbers<[1], [0], [0], [1], [0, 0, 1, 1], [], []>} : vector<8x256xbf16>, vector<256x128xbf16>, vector<8x128xf32> -> vector<8x128xf32>
    %312 = vector.broadcast %232 : vector<1x128xf32> to vector<8x128xf32>
    %313 = arith.addf %311, %312 : vector<8x128xf32>
    %c0_207 = arith.constant 0 : index
    %c6_208 = arith.constant 6 : index
    %c0_209 = arith.constant 0 : index
    %314 = vector.load %arg7[%c0_207, %c6_208, %c0_209] : memref<8x8x128xf32, #tpu.memory_space<vmem>>, vector<8x1x128xf32>
    %315 = vector.shape_cast %314 : vector<8x1x128xf32> to vector<8x128xf32>
    %316 = vector.shape_cast %313 : vector<8x128xf32> to vector<8x1x128xf32>
    tpu.vector_store %arg7[%c0_207, %c6_208, %c0_209], %316 {strides = array<i32>} : memref<8x8x128xf32, #tpu.memory_space<vmem>>, vector<8x1x128xf32>,
    %c7_210 = arith.constant 7 : index
    %c0_211 = arith.constant 0 : index
    %c0_212 = arith.constant 0 : index
    %317 = vector.load %arg9[%c7_210, %c0_211, %c0_212] : memref<8x8x128xf32, #tpu.memory_space<vmem>>, vector<1x8x128xf32>
    %318 = vector.shape_cast %317 : vector<1x8x128xf32> to vector<8x128xf32>
    %c7_213 = arith.constant 7 : index
    %c0_214 = arith.constant 0 : index
    %c0_215 = arith.constant 0 : index
    %319 = vector.load %arg10[%c7_213, %c0_214, %c0_215] : memref<8x8x128xf32, #tpu.memory_space<vmem>>, vector<1x8x128xf32>
    %320 = vector.shape_cast %319 : vector<1x8x128xf32> to vector<8x128xf32>
    %321 = tpu.concatenate %318, %320 in 1 : vector<8x128xf32>, vector<8x128xf32> -> vector<8x256xf32>
    %322 = arith.truncf %321 : vector<8x256xf32> to vector<8x256xbf16>
    %cst_216 = arith.constant dense<0.000000e+00> : vector<8x128xf32>
    %323 = tpu.matmul %322, %231, %cst_216 {dimension_numbers = #tpu.dot_dimension_numbers<[1], [0], [0], [1], [0, 0, 1, 1], [], []>} : vector<8x256xbf16>, vector<256x128xbf16>, vector<8x128xf32> -> vector<8x128xf32>
    %324 = vector.broadcast %232 : vector<1x128xf32> to vector<8x128xf32>
    %325 = arith.addf %323, %324 : vector<8x128xf32>
    %c0_217 = arith.constant 0 : index
    %c7_218 = arith.constant 7 : index
    %c0_219 = arith.constant 0 : index
    %326 = vector.load %arg7[%c0_217, %c7_218, %c0_219] : memref<8x8x128xf32, #tpu.memory_space<vmem>>, vector<8x1x128xf32>
    %327 = vector.shape_cast %326 : vector<8x1x128xf32> to vector<8x128xf32>
    %328 = vector.shape_cast %325 : vector<8x128xf32> to vector<8x1x128xf32>
    tpu.vector_store %arg7[%c0_217, %c7_218, %c0_219], %328 {strides = array<i32>} : memref<8x8x128xf32, #tpu.memory_space<vmem>>, vector<8x1x128xf32>,
    return
  }
  func.func @transform_0(%arg0: i32) -> (i32, i32, i32) {
    %c0_i32 = arith.constant 0 : i32
    %c0_i32_0 = arith.constant 0 : i32
    %c0_i32_1 = arith.constant 0 : i32
    return %arg0, %c0_i32, %c0_i32_0 : i32, i32, i32
  }
  func.func @transform_1(%arg0: i32) -> (i32, i32) {
    %c0_i32 = arith.constant 0 : i32
    %c0_i32_0 = arith.constant 0 : i32
    %c0_i32_1 = arith.constant 0 : i32
    return %c0_i32, %c0_i32_0 : i32, i32
  }
  func.func @transform_2(%arg0: i32) -> (i32, i32) {
    %c0_i32 = arith.constant 0 : i32
    %c0_i32_0 = arith.constant 0 : i32
    %c0_i32_1 = arith.constant 0 : i32
    return %c0_i32, %c0_i32_0 : i32, i32
  }
  func.func @transform_3(%arg0: i32) -> (i32, i32) {
    %c0_i32 = arith.constant 0 : i32
    %c0_i32_0 = arith.constant 0 : i32
    %c0_i32_1 = arith.constant 0 : i32
    return %c0_i32, %c0_i32_0 : i32, i32
  }
  func.func @transform_4(%arg0: i32) -> (i32, i32) {
    %c0_i32 = arith.constant 0 : i32
    %c0_i32_0 = arith.constant 0 : i32
    %c0_i32_1 = arith.constant 0 : i32
    return %c0_i32, %c0_i32_0 : i32, i32
  }
  func.func @transform_5(%arg0: i32) -> (i32, i32) {
    %c0_i32 = arith.constant 0 : i32
    %c0_i32_0 = arith.constant 0 : i32
    %c0_i32_1 = arith.constant 0 : i32
    return %c0_i32, %c0_i32_0 : i32, i32
  }
  func.func @transform_6(%arg0: i32) -> (i32, i32, i32) {
    %c0_i32 = arith.constant 0 : i32
    %c0_i32_0 = arith.constant 0 : i32
    %c0_i32_1 = arith.constant 0 : i32
    return %arg0, %c0_i32, %c0_i32_0 : i32, i32, i32
  }
}

</mosaic_0001>

<bundles_post_ra>
// kernel: tpu_custom_call.1
= control target key start
LH: loop header
LB: loop body
LE: loop exit
PB: predicated region body
PF: predicated region fallthrough
CT: control target
= control target key end

     0   :  { %11 = vsyncpa [#allocation6], 0  ;;  %s3620_s0 = inlined_call_operand.hbm [shape: bf16[8,8,16], index: 0, kind: input, shape index: {}]   ;;  %s3621_s1 = inlined_call_operand.hbm [shape: bf16[16,256], index: 1, kind: input, shape index: {}]   ;;  %s3622_s2 = inlined_call_operand.hbm [shape: bf16[256,256], index: 2, kind: input, shape index: {}]   ;;  %s3623_s3 = inlined_call_operand.vmem [shape: f32[1,256], index: 3, kind: input, shape index: {}]   ;;  %s3624_s4 = inlined_call_operand.hbm [shape: bf16[256,128], index: 4, kind: input, shape index: {}]   ;;  %s3625_s5 = inlined_call_operand.vmem [shape: f32[1,128], index: 5, kind: input, shape index: {}]   ;;  %s3626_s6 = inlined_call_operand.hbm [shape: f32[8,8,128], index: 6, kind: output, shape index: {}]  }
   0x1   :  { %12 = vsyncpa [#allocation9], 0 }
   0x2   :  { %13 = vsyncpa [#allocation12], 0 }
   0x3   :  { %14 = vsyncpa [#allocation7], 0  ;;  %s2739_s21 = smov [#allocation8]   ;;  %s2621_s25 = scalar_lea.hbm %s3621_s1, 256 }
   0x4   :  { %s32_s22 = sshll.u32 %s2739_s21, 4  ;;  %p2622_p0 = scmp.ne.s32.totalorder %s3621_s1, %s2621_s25  ;;  %s33_s22 = int_to_ptr.vmem [resolvable:$true] %s32_s22 }
   0x5   :  { %p2625_p1 = scmp.lt.u32.totalorder %s2621_s25, %s3621_s1 }
   0x7   :  { %p2627_p2 = pnand %p2625_p1, %p2622_p0 }
   0x9   :  { %2630 = shalt.err (!%p2627_p2)
}
   0xa   :  { %s2631_s30 = scalar_lea.vmem %s33_s22, 256  ;;  %p2636_p4 = scmp.lt.s32.totalorder %s33_s22, %s33_s22 }
   0xb   :  { %p2632_p3 = scmp.ne.s32.totalorder %s33_s22, %s2631_s30  ;;  %p2637_p5 = scmp.lt.s32.totalorder %s2631_s30, %s2631_s30 }
   0xd   :  { %p2638_p6 = por %p2637_p5, %p2636_p4 }
   0xf   :  { %p2639_p7 = pnand %p2638_p6, %p2632_p3 }
  0x11   :  { %2642 = shalt.err (!%p2639_p7)
}
  0x12   :  { %s2740_s7 = smov 128   ;;  %s2741_s8 = smov 8  }
  0x13   :  { %38 = dma.hbm_to_vmem [thread:$0]  %s3621_s1, 256, %s33_s22, [#allocation9], %s2740_s7, %s2740_s7, %s2741_s8  }
  0x14   :  { %s2742_s11 = smov [#allocation5]   ;;  %s2643_s15 = scalar_lea.hbm %s3620_s0, 512 }
  0x15   :  { %s20_s12 = sshll.u32 %s2742_s11, 4  ;;  %p2644_p8 = scmp.ne.s32.totalorder %s3620_s0, %s2643_s15  ;;  %s21_s12 = int_to_ptr.vmem [resolvable:$true] %s20_s12 }
  0x16   :  { %p2647_p9 = scmp.lt.u32.totalorder %s2643_s15, %s3620_s0 }
  0x18   :  { %p2649_p10 = pnand %p2647_p9, %p2644_p8 }
  0x1a   :  { %2652 = shalt.err (!%p2649_p10)
}
  0x1b   :  { %s2653_s20 = scalar_lea.vmem %s21_s12, 512  ;;  %p2658_p12 = scmp.lt.s32.totalorder %s21_s12, %s21_s12 }
  0x1c   :  { %p2654_p11 = scmp.ne.s32.totalorder %s21_s12, %s2653_s20  ;;  %p2659_p13 = scmp.lt.s32.totalorder %s2653_s20, %s2653_s20 }
  0x1e   :  { %p2660_p0 = por %p2659_p13, %p2658_p12 }
  0x20   :  { %p2661_p1 = pnand %p2660_p0, %p2654_p11 }
  0x22   :  { %2664 = shalt.err (!%p2661_p1)
}
  0x23   :  { %s2743_s1 = smov 64   ;;  %s2744_s21 = smov 4  }
  0x24   :  { %26 = dma.hbm_to_vmem [thread:$0]  %s3620_s0, 512, %s21_s12, [#allocation6], %s2743_s1, %s2743_s1, %s2744_s21  }
  0x25   :  { %s2745_s24 = smov [#allocation10]   ;;  %s2746_s26 = smov [#allocation11]  }
  0x26   :  { %s44_s25 = sshll.u32 %s2745_s24, 4  ;;  %s58_s27 = sshll.u32 %s2746_s26, 4  ;;  %s45_s25 = int_to_ptr.vmem [resolvable:$true] %s44_s25  ;;  %s2815_s27 = int_to_ptr.vmem [resolvable:$true] %s58_s27 }
  0x27   :  { %s2665_s30 = scalar_lea.hbm %s3622_s2, 4096 }
  0x28   :  { %p2666_p2 = scmp.ne.s32.totalorder %s3622_s2, %s2665_s30  ;;  %p2669_p3 = scmp.lt.u32.totalorder %s2665_s30, %s3622_s2 }
  0x2a   :  { %p2671_p4 = pnand %p2669_p3, %p2666_p2 }
  0x2c   :  { %2674 = shalt.err (!%p2671_p4)
}
  0x2d   :  { %s2675_s0 = scalar_lea.vmem %s45_s25, 4096  ;;  %p2680_p6 = scmp.lt.s32.totalorder %s45_s25, %s45_s25 }
  0x2e   :  { %p2676_p5 = scmp.ne.s32.totalorder %s45_s25, %s2675_s0  ;;  %p2681_p7 = scmp.lt.s32.totalorder %s2675_s0, %s2675_s0 }
  0x30   :  { %p2682_p8 = por %p2681_p7, %p2680_p6 }
  0x32   :  { %p2683_p9 = pnand %p2682_p8, %p2676_p5 }
  0x34   :  { %2686 = shalt.err (!%p2683_p9)
}
  0x35   :  { %50 = dma.hbm_to_vmem [thread:$0]  %s3622_s2, 4096, %s45_s25, [#allocation9], %s2740_s7, %s2740_s7, %s2741_s8  }
  0x36   :  { %s2687_s17 = scalar_lea.hbm %s3624_s4, 2048 }
  0x37   :  { %p2688_p10 = scmp.ne.s32.totalorder %s3624_s4, %s2687_s17  ;;  %p2691_p11 = scmp.lt.u32.totalorder %s2687_s17, %s3624_s4 }
  0x39   :  { %p2693_p12 = pnand %p2691_p11, %p2688_p10 }
  0x3b   :  { %2696 = shalt.err (!%p2693_p12)
}
  0x3c   :  { %s2697_s23 = scalar_lea.vmem %s2815_s27, 2048  ;;  %p2702_p0 = scmp.lt.s32.totalorder %s2815_s27, %s2815_s27 }
  0x3d   :  { %p2698_p13 = scmp.ne.s32.totalorder %s2815_s27, %s2697_s23  ;;  %p2703_p1 = scmp.lt.s32.totalorder %s2697_s23, %s2697_s23 }
  0x3f   :  { %p2704_p2 = por %p2703_p1, %p2702_p0 }
  0x41   :  { %p2705_p3 = pnand %p2704_p2, %p2698_p13 }
  0x43   :  { %2708 = shalt.err (!%p2705_p3)
}
  0x44   :  { %64 = dma.hbm_to_vmem [thread:$0]  %s3624_s4, 2048, %s2815_s27, [#allocation12], %s2743_s1, %s2743_s1, %s2744_s21  }
  0x45   :  { %2731 = dma.done.wait [#allocation6], 512  }
  0x46   :  { %2732 = vsyncadd [#allocation6], 4294966784 }
  0x47   :  { %2733 = dma.done.wait [#allocation9], 4352  }
  0x48   :  { %2734 = vsyncadd [#allocation9], 4294962944 }
  0x49   :  { %2735 = dma.done.wait [#allocation12], 2048  }
  0x4a   :  { %2736 = vsyncadd [#allocation12], 4294965248  ;;  %v2747_v0 = vmov 0   ;;  %v2854_v1 = vld [vmem:[#allocation10 + $0x4] ss:$8 sps:$4 sm:$0xff]   ;;  %vm105_vm0 = vcmask 1041409  }
  0x4b   :  { %520 = vmatprep.mubr.bf16.mxu0 %v2747_v0  ;;  %804 = vmatprep.mubr.bf16.mxu1 %v2747_v0  ;;  %v2856_v2 = vld [vmem:[#allocation10] ss:$8 sps:$4 sm:$0xff]   ;;  %v2859_v3 = vld [vmem:[#allocation10 + $0x14] ss:$8 sps:$4 sm:$0xff]   ;;  %v2862_v4 = vld [vmem:[#allocation10 + $0x10] ss:$8 sps:$4 sm:$0xff]  }
  0x4c   :  { %772 = vmatprep.subr.bf16.mxu1 %v2854_v1  ;;  %v2865_v5 = vld [vmem:[#allocation10 + $0x24] ss:$8 sps:$4 sm:$0xff]   ;;  %v2868_v6 = vld [vmem:[#allocation10 + $0x20] ss:$8 sps:$4 sm:$0xff]   ;;  %v2871_v7 = vld [vmem:[#allocation10 + $0x34] ss:$8 sps:$4 sm:$0xff]  }
  0x4d   :  { %773 = vmatpush1.bf16.msra.mxu1 %v2856_v2  ;;  %vm108_vm1 = vcmask 1042434   ;;  %vm111_vm2 = vcmask 1043459   ;;  %vm114_vm3 = vcmask 1044484   ;;  %v2874_v8 = vld [vmem:[#allocation10 + $0x30] ss:$8 sps:$4 sm:$0xff]   ;;  %v593_v12 = vld [vmem:[#allocation10 + $0x80] sm:$0xff] }
  0x4e   :  { %774 = vmatprep.subr.bf16.mxu1 %v2859_v3  ;;  %v2524_v9 = vld [vmem:[#allocation8 + $0x4] ss:$8 sps:$4 sm:$0xff]   ;;  %v2527_v10 = vld [vmem:[#allocation8] ss:$8 sps:$4 sm:$0xff]   ;;  %v2877_v11 = vld [vmem:[#allocation10 + $0x44] ss:$8 sps:$4 sm:$0xff]  }
  0x4f   :  { %v594_v13 = vld [vmem:[#allocation10 + $0x88] sm:$0xff]  ;;  %vm117_vm4 = vcmask 1045509   ;;  %vm120_vm5 = vcmask 1046534   ;;  %488 = vmatprep.subr.bf16.mxu0 %v2524_v9  ;;  %v80_v15 = vld [vmem:[#allocation5] sm:$0x1]  ;;  %vm123_vm6 = vcmask 1047559  }
  0x50   :  { %v2879_v14 = vld [vmem:[#allocation10 + $0x40] ss:$8 sps:$4 sm:$0xff]   ;;  %v81_v16 = vld [vmem:[#allocation5 + $0x4] sm:$0x1]  ;;  %v82_v17 = vld [vmem:[#allocation5 + $0x8] sm:$0x1]  ;;  %489 = vmatpush1.bf16.msra.mxu0 %v2527_v10  ;;  %v96_v22 = vunpack.c.l.b16 %v80_v15  ;;  %v2884_v31 = vcombine.low %v593_v12, %v594_v13 }
  0x51   :  { %775 = vmatpush1.bf16.msra.mxu1 %v2862_v4  ;;  %v2881_v18 = vld [vmem:[#allocation10 + $0x54] ss:$8 sps:$4 sm:$0xff]   ;;  %v84_v20 = vld [vmem:[#allocation5 + $0x10] sm:$0x1]  ;;  %v85_v21 = vld [vmem:[#allocation5 + $0x14] sm:$0x1]  ;;  %v97_v23 = vunpack.c.l.b16 %v81_v16  ;;  %v98_v24 = vunpack.c.l.b16 %v82_v17  ;;  %825 = vmatprep.subr.bf16.mxu0 %v2854_v1 }
  0x52   :  { %776 = vmatprep.subr.bf16.mxu1 %v2865_v5  ;;  %v83_v19 = vld [vmem:[#allocation5 + $0xc] sm:$0x1]  ;;  %v86_v25 = vld [vmem:[#allocation5 + $0x18] sm:$0x1]  ;;  %v87_v26 = vld [vmem:[#allocation5 + $0x1c] sm:$0x1]  ;;  %v100_v28 = vunpack.c.l.b16 %v84_v20  ;;  %v101_v29 = vunpack.c.l.b16 %v85_v21 }
  0x53   :  { %v99_v27 = vunpack.c.l.b16 %v83_v19  ;;  %v129_v30 = vld [vmem:[#allocation5] sm:$0x1]  ;;  %v102_v32 = vunpack.c.l.b16 %v86_v25  ;;  %v103_v33 = vunpack.c.l.b16 %v87_v26  ;;  %v104_v34 = vrot.slane %v97_v23, 7  ;;  %v130_v36 = vld [vmem:[#allocation5 + $0x4] sm:$0x1] }
  0x54   :  { %v107_v35 = vrot.slane %v98_v24, 6  ;;  %vm127_vm7 = vcmask 125952   ;;  %v131_v37 = vld [vmem:[#allocation5 + $0x8] sm:$0x1]  ;;  %v113_v40 = vrot.slane %v100_v28, 4  ;;  %v116_v41 = vrot.slane %v101_v29, 3 }
  0x55   :  { %777 = vmatpush1.bf16.msra.mxu1 %v2868_v6  ;;  %v2888_v38 = vld [vmem:[#allocation10 + $0x50] ss:$8 sps:$4 sm:$0xff]   ;;  %v110_v39 = vrot.slane %v99_v27, 5  ;;  %v132_v42 = vld [vmem:[#allocation5 + $0xc] sm:$0x1]  ;;  %v145_v43 = vunpack.c.l.b16 %v129_v30  ;;  %v106_v44 = vsel %vm105_vm0, %v104_v34, %v96_v22  ;;  %v119_v45 = vrot.slane %v102_v32, 2 }
  0x56   :  { %778 = vmatprep.subr.bf16.mxu1 %v2871_v7  ;;  %v122_v46 = vrot.slane %v103_v33, 1  ;;  %v133_v47 = vld [vmem:[#allocation5 + $0x10] sm:$0x1]  ;;  %v134_v48 = vld [vmem:[#allocation5 + $0x14] sm:$0x1]  ;;  %v146_v49 = vunpack.c.l.b16 %v130_v36  ;;  %v109_v50 = vsel %vm108_vm1, %v107_v35, %v106_v44  ;;  %v147_v53 = vunpack.c.l.b16 %v131_v37 }
  0x57   :  { %v135_v51 = vld [vmem:[#allocation5 + $0x18] sm:$0x1]  ;;  %v136_v52 = vld [vmem:[#allocation5 + $0x1c] sm:$0x1]  ;;  %v148_v54 = vunpack.c.l.b16 %v132_v42  ;;  %v149_v55 = vunpack.c.l.b16 %v133_v47  ;;  %v112_v57 = vsel %vm111_vm2, %v110_v39, %v109_v50  ;;  %v150_v58 = vunpack.c.l.b16 %v134_v48  ;;  %v2900_v12 = vld [vmem:[#allocation10 + $0x74] ss:$8 sps:$4 sm:$0xff]  }
  0x58   :  { %v2894_v56 = vld [vmem:[#allocation10 + $0x64] ss:$8 sps:$4 sm:$0xff]   ;;  %v151_v59 = vunpack.c.l.b16 %v135_v51  ;;  %v152_v60 = vunpack.c.l.b16 %v136_v52  ;;  %v2897_v61 = vld [vmem:[#allocation10 + $0x60] ss:$8 sps:$4 sm:$0xff]   ;;  %v115_v62 = vsel %vm114_vm3, %v113_v40, %v112_v57  ;;  %v153_v63 = vrot.slane %v145_v43, 1 }
  0x59   :  { %779 = vmatpush1.bf16.msra.mxu1 %v2874_v8  ;;  %v155_v9 = vrot.slane %v147_v53, 7  ;;  %v157_v10 = vrot.slane %v148_v54, 6  ;;  %v118_v13 = vsel %vm117_vm4, %v116_v41, %v115_v62  ;;  %v159_v15 = vrot.slane %v149_v55, 5  ;;  %v171_v19 = vld [vmem:[#allocation5] sm:$0x2] }
  0x5a   :  { %780 = vmatprep.subr.bf16.mxu1 %v2877_v11  ;;  %v161_v16 = vrot.slane %v150_v58, 4  ;;  %v163_v17 = vrot.slane %v151_v59, 3  ;;  %v121_v20 = vsel %vm120_vm5, %v119_v45, %v118_v13  ;;  %v154_v21 = vsel %vm105_vm0, %v146_v49, %v153_v63  ;;  %v172_v23 = vld [vmem:[#allocation5 + $0x4] sm:$0x2]  ;;  %v173_v24 = vld [vmem:[#allocation5 + $0x8] sm:$0x2] }
  0x5b   :  { %v165_v22 = vrot.slane %v152_v60, 2  ;;  %v187_v25 = vunpack.c.l.b16 %v171_v19  ;;  %v124_v26 = vsel %vm123_vm6, %v122_v46, %v121_v20  ;;  %v156_v27 = vsel %vm108_vm1, %v155_v9, %v154_v21  ;;  %v174_v28 = vld [vmem:[#allocation5 + $0xc] sm:$0x2]  ;;  %v175_v29 = vld [vmem:[#allocation5 + $0x10] sm:$0x2] }
  0x5c   :  { %v176_v30 = vld [vmem:[#allocation5 + $0x14] sm:$0x2]  ;;  %v188_v32 = vunpack.c.l.b16 %v172_v23  ;;  %v189_v33 = vunpack.c.l.b16 %v173_v24  ;;  %v2909_v34 = vld [vmem:[#allocation10 + $0x70] ss:$8 sps:$4 sm:$0xff]   ;;  %v125_v35 = vpack.c.b16 %v124_v26, %v124_v26  ;;  %v158_v36 = vsel %vm111_vm2, %v157_v10, %v156_v27  ;;  %v177_v37 = vld [vmem:[#allocation5 + $0x18] sm:$0x2] }
  0x5d   :  { %781 = vmatpush1.bf16.msra.mxu1 %v2879_v14  ;;  %v178_v39 = vld [vmem:[#allocation5 + $0x1c] sm:$0x2]  ;;  %v190_v40 = vunpack.c.l.b16 %v174_v28  ;;  %v191_v41 = vunpack.c.l.b16 %v175_v29  ;;  %v213_v42 = vld [vmem:[#allocation5] sm:$0x2]  ;;  %v160_v44 = vsel %vm114_vm3, %v159_v15, %v158_v36  ;;  %v192_v45 = vunpack.c.l.b16 %v176_v30  ;;  %v214_v48 = vld [vmem:[#allocation5 + $0x4] sm:$0x2] }
  0x5e   :  { %782 = vmatprep.subr.bf16.mxu1 %v2881_v18  ;;  %v2912_v43 = vld [vmem:[#allocation10 + $0x84] ss:$8 sps:$4 sm:$0xff]   ;;  %v193_v46 = vunpack.c.l.b16 %v177_v37  ;;  %v194_v47 = vunpack.c.l.b16 %v178_v39  ;;  %v215_v49 = vld [vmem:[#allocation5 + $0x8] sm:$0x2]  ;;  %v2915_v50 = vld [vmem:[#allocation5 + $0xc] sm:$0x2]  ;;  %v162_v51 = vsel %vm117_vm4, %v161_v16, %v160_v44  ;;  %v229_v16 = vunpack.c.l.b16 %v213_v42 }
  0x5f   :  { %128 = vst.msk [vmem:[#allocation2] sm:$0xf] %vm127_vm7, %v125_v35  ;;  %v195_v52 = vrot.slane %v187_v25, 2  ;;  %v196_v53 = vrot.slane %v188_v32, 1  ;;  %v199_v54 = vrot.slane %v190_v40, 7  ;;  %v164_v57 = vsel %vm120_vm5, %v163_v17, %v162_v51  ;;  %v597_v21 = vld [vmem:[#allocation10 + $0xa0] sm:$0xff] }
  0x60   :  { %v217_v55 = vld [vmem:[#allocation5 + $0x10] sm:$0x2]  ;;  %v201_v58 = vrot.slane %v191_v41, 6  ;;  %v203_v59 = vrot.slane %v192_v45, 5  ;;  %v205_v60 = vrot.slane %v193_v46, 4  ;;  %v166_v63 = vsel %vm123_vm6, %v165_v22, %v164_v57  ;;  %v598_v23 = vld [vmem:[#allocation10 + $0xa8] sm:$0xff] }
  0x61   :  { %783 = vmatpush1.bf16.msra.mxu1 %v2888_v38  ;;  %v218_v62 = vld [vmem:[#allocation5 + $0x14] sm:$0x2]  ;;  %v197_v9 = vsel %vm105_vm0, %v196_v53, %v195_v52  ;;  %v207_v10 = vrot.slane %v194_v47, 3  ;;  %v219_v13 = vld [vmem:[#allocation5 + $0x18] sm:$0x2]  ;;  %v167_v19 = vpack.c.b16 %v166_v63, %v166_v63  ;;  %vm475_vm8 = vcmask 130048  }
  0x62   :  { %784 = vmatprep.subr.bf16.mxu1 %v2894_v56  ;;  %v220_v15 = vld [vmem:[#allocation5 + $0x1c] sm:$0x2]  ;;  %v2924_v20 = vld [vmem:[#allocation10 + $0x94] ss:$8 sps:$4 sm:$0xff]   ;;  %v198_v17 = vsel %vm108_vm1, %v189_v33, %v197_v9  ;;  %v230_v24 = vunpack.c.l.b16 %v214_v48  ;;  %v231_v25 = vunpack.c.l.b16 %v215_v49  ;;  %v232_v26 = vunpack.c.l.b16 %v2915_v50  ;;  %v255_v29 = vld [vmem:[#allocation5] sm:$0x4] }
  0x63   :  { %v200_v22 = vsel %vm111_vm2, %v199_v54, %v198_v17  ;;  %v233_v27 = vunpack.c.l.b16 %v217_v55  ;;  %v234_v28 = vunpack.c.l.b16 %v218_v62  ;;  %v256_v30 = vld [vmem:[#allocation5 + $0x4] sm:$0x4]  ;;  %v257_v32 = vld [vmem:[#allocation5 + $0x8] sm:$0x4]  ;;  %170 = vst.msk [vmem:[#allocation2 + $0x4] sm:$0xf] %vm127_vm7, %v167_v19  ;;  %v235_v33 = vunpack.c.l.b16 %v219_v13 }
  0x64   :  { %v202_v35 = vsel %vm114_vm3, %v201_v58, %v200_v22  ;;  %v236_v36 = vunpack.c.l.b16 %v220_v15  ;;  %v237_v37 = vrot.slane %v229_v16, 3  ;;  %v258_v39 = vld [vmem:[#allocation5 + $0xc] sm:$0x4]  ;;  %v2933_v40 = vld [vmem:[#allocation5 + $0x10] sm:$0x4]  ;;  %v238_v42 = vrot.slane %v230_v24, 2 }
  0x65   :  { %785 = vmatpush1.bf16.msra.mxu1 %v2897_v61  ;;  %v204_v41 = vsel %vm117_vm4, %v203_v59, %v202_v35  ;;  %v240_v44 = vrot.slane %v231_v25, 1  ;;  %v243_v45 = vrot.slane %v233_v27, 7  ;;  %v260_v46 = vld [vmem:[#allocation5 + $0x14] sm:$0x4]  ;;  %v245_v48 = vrot.slane %v234_v28, 6 }
  0x66   :  { %786 = vmatprep.subr.bf16.mxu1 %v2900_v12  ;;  %v206_v47 = vsel %vm120_vm5, %v205_v60, %v204_v41  ;;  %v247_v49 = vrot.slane %v235_v33, 5  ;;  %v249_v50 = vrot.slane %v236_v36, 4  ;;  %v2938_v51 = vld [vmem:[#allocation10 + $0x90] ss:$8 sps:$4 sm:$0xff]   ;;  %v239_v53 = vsel %vm105_vm0, %v238_v42, %v237_v37  ;;  %v261_v55 = vld [vmem:[#allocation5 + $0x18] sm:$0x4] }
  0x67   :  { %v208_v52 = vsel %vm123_vm6, %v207_v10, %v206_v47  ;;  %v2942_v54 = vcombine.low %v597_v21, %v598_v23  ;;  %v262_v57 = vld [vmem:[#allocation5 + $0x1c] sm:$0x4]  ;;  %v271_v58 = vunpack.c.l.b16 %v255_v29  ;;  %v241_v62 = vsel %vm108_vm1, %v240_v44, %v239_v53  ;;  %v297_v13 = vld [vmem:[#allocation5] sm:$0x4]  ;;  %v298_v21 = vld [vmem:[#allocation5 + $0x4] sm:$0x4] }
  0x68   :  { %v2945_v59 = vld [vmem:[#allocation10 + $0xa4] ss:$8 sps:$4 sm:$0xff]   ;;  %v209_v60 = vpack.c.b16 %v208_v52, %v208_v52  ;;  %v272_v63 = vunpack.c.l.b16 %v256_v30  ;;  %v273_v9 = vunpack.c.l.b16 %v257_v32  ;;  %v242_v15 = vsel %vm111_vm2, %v232_v26, %v241_v62  ;;  %v299_v23 = vld [vmem:[#allocation5 + $0x8] sm:$0x4]  ;;  %v300_v17 = vld [vmem:[#allocation5 + $0xc] sm:$0x4] }
  0x69   :  { %787 = vmatpush1.bf16.msra.mxu1 %v2909_v34  ;;  %v274_v10 = vunpack.c.l.b16 %v258_v39  ;;  %v275_v16 = vunpack.c.l.b16 %v2933_v40  ;;  %v276_v19 = vunpack.c.l.b16 %v260_v46  ;;  %v244_v24 = vsel %vm114_vm3, %v243_v45, %v242_v15  ;;  %v2952_v25 = vld [vmem:[#allocation10 + $0xb4] ss:$8 sps:$4 sm:$0xff]   ;;  %v301_v29 = vld [vmem:[#allocation5 + $0x10] sm:$0x4]  ;;  %v2954_v30 = vld [vmem:[#allocation5 + $0x14] sm:$0x4] }
  0x6a   :  { %788 = vmatprep.subr.bf16.mxu1 %v2912_v43  ;;  %212 = vst.msk [vmem:[#allocation2 + $0x8] sm:$0xf] %vm127_vm7, %v209_v60  ;;  %v277_v22 = vunpack.c.l.b16 %v261_v55  ;;  %v278_v27 = vunpack.c.l.b16 %v262_v57  ;;  %v279_v28 = vrot.slane %v271_v58, 4  ;;  %v2530_v26 = vld [vmem:[#allocation2] sm:$0xff]   ;;  %v246_v32 = vsel %vm117_vm4, %v245_v48, %v244_v24  ;;  %v303_v42 = vld [vmem:[#allocation5 + $0x18] sm:$0x4] }
  0x6b   :  { %v280_v35 = vrot.slane %v272_v63, 3  ;;  %v282_v33 = vrot.slane %v273_v9, 2  ;;  %v284_v36 = vrot.slane %v274_v10, 1  ;;  %v248_v37 = vsel %vm120_vm5, %v247_v49, %v246_v32  ;;  %2229 = vmatmul.mubr.msk.bf16.vlgmr.msra.gmra.mrb[0].mxu0 %vm475_vm8, %v2530_v26  ;;  %v304_v46 = vld [vmem:[#allocation5 + $0x1c] sm:$0x4]  ;;  %v601_v55 = vld [vmem:[#allocation10 + $0xc0] sm:$0xff] }
  0x6c   :  { %v287_v39 = vrot.slane %v276_v19, 7  ;;  %v289_v40 = vrot.slane %v277_v22, 6  ;;  %v291_v41 = vrot.slane %v278_v27, 5  ;;  %v250_v44 = vsel %vm123_vm6, %v249_v50, %v248_v37  ;;  %530 = vmatprep.mubr.bf16.mxu0 %v2747_v0  ;;  %v2964_v53 = vld [vmem:[#allocation10 + $0xb0] ss:$8 sps:$4 sm:$0xff]   ;;  %v602_v49 = vld [vmem:[#allocation10 + $0xc8] sm:$0xff]  ;;  %826 = vmatpush1.bf16.msra.mxu0 %v2856_v2 }
  0x6d   :  { %789 = vmatpush1.bf16.msra.mxu1 %v2884_v31  ;;  %v281_v45 = vsel %vm105_vm0, %v280_v35, %v279_v28  ;;  %v313_v47 = vunpack.c.l.b16 %v297_v13  ;;  %v314_v48 = vunpack.c.l.b16 %v298_v21  ;;  %v251_v52 = vpack.c.b16 %v250_v44, %v250_v44  ;;  %v2969_v50 = vld [vmem:[#allocation10 + $0xc4] ss:$8 sps:$4 sm:$0xff]   ;;  %v339_v15 = vld [vmem:[#allocation5] sm:$0x8]  ;;  %v340_v10 = vld [vmem:[#allocation5 + $0x4] sm:$0x8]  ;;  %827 = vmatprep.subr.bf16.mxu0 %v2859_v3 }
  0x6e   :  { %790 = vmatprep.subr.bf16.mxu1 %v2924_v20  ;;  %v283_v57 = vsel %vm108_vm1, %v282_v33, %v281_v45  ;;  %v315_v58 = vunpack.c.l.b16 %v299_v23  ;;  %v316_v60 = vunpack.c.l.b16 %v300_v17  ;;  %v317_v63 = vunpack.c.l.b16 %v301_v29  ;;  %v341_v24 = vld [vmem:[#allocation5 + $0x8] sm:$0x8]  ;;  %v342_v22 = vld [vmem:[#allocation5 + $0xc] sm:$0x8]  ;;  %v344_v37 = vld [vmem:[#allocation5 + $0x14] sm:$0x8] }
  0x6f   :  { %v285_v62 = vsel %vm111_vm2, %v284_v36, %v283_v57  ;;  %v318_v9 = vunpack.c.l.b16 %v2954_v30  ;;  %v319_v13 = vunpack.c.l.b16 %v303_v42  ;;  %254 = vst.msk [vmem:[#allocation2 + $0xc] sm:$0xf] %vm127_vm7, %v251_v52  ;;  %v320_v21 = vunpack.c.l.b16 %v304_v46  ;;  %v343_v36 = vld [vmem:[#allocation5 + $0x10] sm:$0x8]  ;;  %v2986_v44 = vld [vmem:[#allocation5 + $0x18] sm:$0x8] }
  0x70   :  { %v286_v19 = vsel %vm114_vm3, %v275_v16, %v285_v62  ;;  %v321_v23 = vrot.slane %v313_v47, 5  ;;  %v322_v17 = vrot.slane %v314_v48, 4  ;;  %v324_v28 = vrot.slane %v315_v58, 3  ;;  %828 = vmatpush1.bf16.msra.mxu0 %v2862_v4  ;;  %v346_v45 = vld [vmem:[#allocation5 + $0x1c] sm:$0x8] }
  0x71   :  { %791 = vmatpush1.bf16.msra.mxu1 %v2938_v51  ;;  %v288_v27 = vsel %vm117_vm4, %v287_v39, %v286_v19  ;;  %v326_v29 = vrot.slane %v316_v60, 2  ;;  %v328_v30 = vrot.slane %v317_v63, 1  ;;  %v331_v35 = vrot.slane %v319_v13, 7  ;;  %829 = vmatprep.subr.bf16.mxu0 %v2865_v5  ;;  %v2991_v48 = vld [vmem:[#allocation10 + $0xd4] ss:$8 sps:$4 sm:$0xff]  }
  0x72   :  { %792 = vmatprep.subr.bf16.mxu1 %v2945_v59  ;;  %v290_v26 = vsel %vm120_vm5, %v289_v40, %v288_v27  ;;  %v323_v32 = vsel %vm105_vm0, %v322_v17, %v321_v23  ;;  %v333_v33 = vrot.slane %v320_v21, 6  ;;  %v2984_v39 = vcombine.low %v601_v55, %v602_v49  ;;  %v382_v58 = vld [vmem:[#allocation5 + $0x4] sm:$0x8]  ;;  %v2994_v49 = vld [vmem:[#allocation10 + $0xd0] ss:$8 sps:$4 sm:$0xff]  }
  0x73   :  { %v292_v16 = vsel %vm123_vm6, %v291_v41, %v290_v26  ;;  %v325_v42 = vsel %vm108_vm1, %v324_v28, %v323_v32  ;;  %v355_v40 = vunpack.c.l.b16 %v339_v15  ;;  %v356_v52 = vunpack.c.l.b16 %v340_v10  ;;  %v381_v41 = vld [vmem:[#allocation5] sm:$0x8]  ;;  %v383_v13 = vld [vmem:[#allocation5 + $0x8] sm:$0x8]  ;;  %v384_v15 = vld [vmem:[#allocation5 + $0xc] sm:$0x8] }
  0x74   :  { %v293_v46 = vpack.c.b16 %v292_v16, %v292_v16  ;;  %v327_v47 = vsel %vm111_vm2, %v326_v29, %v325_v42  ;;  %v357_v57 = vunpack.c.l.b16 %v341_v24  ;;  %v358_v60 = vunpack.c.l.b16 %v342_v22  ;;  %v385_v19 = vld [vmem:[#allocation5 + $0x10] sm:$0x8]  ;;  %v2998_v23 = vld [vmem:[#allocation10 + $0xe4] ss:$8 sps:$4 sm:$0xff]   ;;  %v387_v28 = vld [vmem:[#allocation5 + $0x18] sm:$0x8]  ;;  %830 = vmatpush1.bf16.msra.mxu0 %v2868_v6 }
  0x75   :  { %793 = vmatpush1.bf16.msra.mxu1 %v2942_v54  ;;  %v329_v55 = vsel %vm114_vm3, %v328_v30, %v327_v47  ;;  %v359_v62 = vunpack.c.l.b16 %v343_v36  ;;  %v360_v63 = vunpack.c.l.b16 %v344_v37  ;;  %v361_v10 = vunpack.c.l.b16 %v2986_v44  ;;  %v386_v27 = vld [vmem:[#allocation5 + $0x14] sm:$0x8]  ;;  %831 = vmatprep.subr.bf16.mxu0 %v2871_v7 }
  0x76   :  { %794 = vmatprep.subr.bf16.mxu1 %v2952_v25  ;;  %296 = vst.msk [vmem:[#allocation2 + $0x10] sm:$0xf] %vm127_vm7, %v293_v46  ;;  %v330_v21 = vsel %vm117_vm4, %v318_v9, %v329_v55  ;;  %v362_v17 = vunpack.c.l.b16 %v346_v45  ;;  %v363_v24 = vrot.slane %v355_v40, 6  ;;  %v2536_v22 = vld [vmem:[#allocation2 + $0x8] sm:$0xff]   ;;  %v364_v30 = vrot.slane %v356_v52, 5  ;;  %v605_v44 = vld [vmem:[#allocation10 + $0xe0] sm:$0xff] }
  0x77   :  { %v332_v29 = vsel %vm120_vm5, %v331_v35, %v330_v21  ;;  %v366_v26 = vrot.slane %v357_v57, 4  ;;  %v368_v32 = vrot.slane %v358_v60, 3  ;;  %v370_v36 = vrot.slane %v359_v62, 2  ;;  %2230 = vmatmul.mubr.msk.bf16.gmra.mrb[4].mxu0 %vm475_vm8, %v2536_v22  ;;  %v606_v45 = vld [vmem:[#allocation10 + $0xe8] sm:$0xff] }
  0x78   :  { %v334_v9 = vsel %vm123_vm6, %v333_v33, %v332_v29  ;;  %v372_v37 = vrot.slane %v360_v63, 1  ;;  %v375_v16 = vrot.slane %v362_v17, 7  ;;  %v365_v35 = vsel %vm105_vm0, %v364_v30, %v363_v24  ;;  %540 = vmatprep.mubr.bf16.mxu0 %v2747_v0  ;;  %832 = vmatpush1.bf16.msra.mxu0 %v2874_v8  ;;  %v388_v60 = vld [vmem:[#allocation5 + $0x1c] sm:$0x8] }
  0x79   :  { %795 = vmatpush1.bf16.msra.mxu1 %v2964_v53  ;;  %v335_v42 = vpack.c.b16 %v334_v9, %v334_v9  ;;  %v397_v40 = vunpack.c.l.b16 %v381_v41  ;;  %v398_v46 = vunpack.c.l.b16 %v382_v58  ;;  %v367_v47 = vsel %vm108_vm1, %v366_v26, %v365_v35  ;;  %v3015_v41 = vld [vmem:[#allocation10 + $0xf4] ss:$8 sps:$4 sm:$0xff]   ;;  %833 = vmatprep.subr.bf16.mxu0 %v2877_v11  ;;  %v3025_v26 = vld [vmem:[#allocation10 + $0xf0] ss:$8 sps:$4 sm:$0xff]  }
  0x7a   :  { %796 = vmatprep.subr.bf16.mxu1 %v2969_v50  ;;  %v399_v52 = vunpack.c.l.b16 %v383_v13  ;;  %v400_v33 = vunpack.c.l.b16 %v384_v15  ;;  %v401_v57 = vunpack.c.l.b16 %v385_v19  ;;  %v369_v55 = vsel %vm111_vm2, %v368_v32, %v367_v47 }
  0x7b   :  { %338 = vst.msk [vmem:[#allocation2 + $0x14] sm:$0xf] %vm127_vm7, %v335_v42  ;;  %v402_v62 = vunpack.c.l.b16 %v386_v27  ;;  %v403_v63 = vunpack.c.l.b16 %v387_v28  ;;  %v371_v58 = vsel %vm114_vm3, %v370_v36, %v369_v55  ;;  %v405_v13 = vrot.slane %v397_v40, 7 }
  0x7c   :  { %v406_v15 = vrot.slane %v398_v46, 6  ;;  %v408_v19 = vrot.slane %v399_v52, 5  ;;  %v373_v21 = vsel %vm117_vm4, %v372_v37, %v371_v58  ;;  %v410_v17 = vrot.slane %v400_v33, 4  ;;  %834 = vmatpush1.bf16.msra.mxu0 %v2879_v14 }
  0x7d   :  { %797 = vmatpush1.bf16.msra.mxu1 %v2984_v39  ;;  %v412_v24 = vrot.slane %v401_v57, 3  ;;  %v414_v22 = vrot.slane %v402_v62, 2  ;;  %v374_v29 = vsel %vm120_vm5, %v361_v10, %v373_v21  ;;  %v416_v28 = vrot.slane %v403_v63, 1  ;;  %835 = vmatprep.subr.bf16.mxu0 %v2881_v18 }
  0x7e   :  { %798 = vmatprep.subr.bf16.mxu1 %v2991_v48  ;;  %v407_v27 = vsel %vm105_vm0, %v406_v15, %v405_v13  ;;  %v3023_v30 = vcombine.low %v605_v44, %v606_v45  ;;  %v376_v32 = vsel %vm123_vm6, %v375_v16, %v374_v29  ;;  %v404_v37 = vunpack.c.l.b16 %v388_v60 }
  0x7f   :  { %v409_v9 = vsel %vm108_vm1, %v408_v19, %v407_v27  ;;  %v377_v36 = vpack.c.b16 %v376_v32, %v376_v32 }
  0x80   :  { %v411_v42 = vsel %vm111_vm2, %v410_v17, %v409_v9  ;;  %836 = vmatpush1.bf16.msra.mxu0 %v2888_v38 }
  0x81   :  { %799 = vmatpush1.bf16.msra.mxu1 %v2994_v49  ;;  %v413_v10 = vsel %vm114_vm3, %v412_v24, %v411_v42  ;;  %380 = vst.msk [vmem:[#allocation2 + $0x18] sm:$0xf] %vm127_vm7, %v377_v36  ;;  %837 = vmatprep.subr.bf16.mxu0 %v2894_v56 }
  0x82   :  { %800 = vmatprep.subr.bf16.mxu1 %v2998_v23  ;;  %v2542_v44 = vld [vmem:[#allocation2 + $0x10] sm:$0xff]   ;;  %v415_v45 = vsel %vm117_vm4, %v414_v22, %v413_v10 }
  0x83   :  { %v417_v16 = vsel %vm120_vm5, %v416_v28, %v415_v45  ;;  %2231 = vmatmul.mubr.msk.bf16.gmra.mrb[8].mxu0 %vm475_vm8, %v2542_v44 }
  0x84   :  { %v418_v35 = vsel %vm123_vm6, %v404_v37, %v417_v16  ;;  %550 = vmatprep.mubr.bf16.mxu0 %v2747_v0  ;;  %838 = vmatpush1.bf16.msra.mxu0 %v2897_v61 }
  0x85   :  { %801 = vmatpush1.bf16.msra.mxu1 %v3023_v30  ;;  %v419_v40 = vpack.c.b16 %v418_v35, %v418_v35  ;;  %839 = vmatprep.subr.bf16.mxu0 %v2900_v12 }
  0x86   :  { %802 = vmatprep.subr.bf16.mxu1 %v3015_v41 }
  0x87   :  { %422 = vst.msk [vmem:[#allocation2 + $0x1c] sm:$0xf] %vm127_vm7, %v419_v40 }
  0x88   :  { %840 = vmatpush1.bf16.msra.mxu0 %v2909_v34 }
  0x89   :  { %803 = vmatpush1.bf16.msra.mxu1 %v3025_v26  ;;  %841 = vmatprep.subr.bf16.mxu0 %v2912_v43 }
  0x8a   :  { %878 = vmatprep.subr.bf16.mxu1 %v2854_v1 }
  0x8c   :  { %805 = vmatmul.mubr.bf16.vlgmr.msra.gmra.mrb[0].mxu1 %v2747_v0  ;;  %842 = vmatpush1.bf16.msra.mxu0 %v2884_v31  ;;  %v435_v0 = vlaneseq }
  0x8d   :  { %879 = vmatpush1.bf16.msra.mxu1 %v2856_v2  ;;  %843 = vmatprep.subr.bf16.mxu0 %v2924_v20 }
  0x8e   :  { %880 = vmatprep.subr.bf16.mxu1 %v2859_v3  ;;  %v2548_v46 = vld [vmem:[#allocation2 + $0x18] sm:$0xff]   ;;  %v3100_v2 = vshrl.u32 %v435_v0, 7 }
  0x8f   :  { %2232 = vmatmul.mubr.msk.bf16.gmra.mrb[12].mxu0 %vm475_vm8, %v2548_v46 }
  0x90   :  { %844 = vmatpush1.bf16.msra.mxu0 %v2938_v51  ;;  %v441_v3 = vsub.s32 1, %v3100_v2 }
  0x91   :  { %881 = vmatpush1.bf16.msra.mxu1 %v2862_v4  ;;  %845 = vmatprep.subr.bf16.mxu0 %v2945_v59  ;;  %v433_v4 = vld [vmem:[%s3623_s3] sm:$0x3] }
  0x92   :  { %882 = vmatprep.subr.bf16.mxu1 %v2865_v5  ;;  %v437_v5 = vsub.s32 0, %v3100_v2 }
  0x94   :  { %846 = vmatpush1.bf16.msra.mxu0 %v2942_v54 }
  0x95   :  { %883 = vmatpush1.bf16.msra.mxu1 %v2868_v6  ;;  %847 = vmatprep.subr.bf16.mxu0 %v2952_v25  ;;  %v442_v6 = vrot.slane %v433_v4, %v441_v3 }
  0x96   :  { %884 = vmatprep.subr.bf16.mxu1 %v2871_v7  ;;  %v438_v7 = vrot.slane %v433_v4, %v437_v5 }
  0x98   :  { %848 = vmatpush1.bf16.msra.mxu0 %v2964_v53 }
  0x99   :  { %885 = vmatpush1.bf16.msra.mxu1 %v2874_v8  ;;  %849 = vmatprep.subr.bf16.mxu0 %v2969_v50 }
  0x9a   :  { %886 = vmatprep.subr.bf16.mxu1 %v2877_v11 }
  0x9c   :  { %850 = vmatpush1.bf16.msra.mxu0 %v2984_v39 }
  0x9d   :  { %887 = vmatpush1.bf16.msra.mxu1 %v2879_v14  ;;  %851 = vmatprep.subr.bf16.mxu0 %v2991_v48 }
  0x9e   :  { %888 = vmatprep.subr.bf16.mxu1 %v2881_v18 }
  0xa0   :  { %852 = vmatpush1.bf16.msra.mxu0 %v2994_v49 }
  0xa1   :  { %889 = vmatpush1.bf16.msra.mxu1 %v2888_v38  ;;  %853 = vmatprep.subr.bf16.mxu0 %v2998_v23 }
  0xa2   :  { %890 = vmatprep.subr.bf16.mxu1 %v2894_v56 }
  0xa4   :  { %854 = vmatpush1.bf16.msra.mxu0 %v3023_v30 }
  0xa5   :  { %891 = vmatpush1.bf16.msra.mxu1 %v2897_v61  ;;  %855 = vmatprep.subr.bf16.mxu0 %v3015_v41 }
  0xa6   :  { %892 = vmatprep.subr.bf16.mxu1 %v2900_v12 }
  0xa8   :  { %856 = vmatpush1.bf16.msra.mxu0 %v3025_v26 }
  0xa9   :  { %893 = vmatpush1.bf16.msra.mxu1 %v2909_v34  ;;  %931 = vmatprep.subr.bf16.mxu0 %v2854_v1 }
  0xaa   :  { %894 = vmatprep.subr.bf16.mxu1 %v2912_v43 }
  0xad   :  { %895 = vmatpush1.bf16.msra.mxu1 %v2884_v31 }
  0xae   :  { %896 = vmatprep.subr.bf16.mxu1 %v2924_v20 }
  0xb1   :  { %897 = vmatpush1.bf16.msra.mxu1 %v2938_v51 }
  0xb2   :  { %898 = vmatprep.subr.bf16.mxu1 %v2945_v59 }
  0xb5   :  { %899 = vmatpush1.bf16.msra.mxu1 %v2942_v54 }
  0xb6   :  { %900 = vmatprep.subr.bf16.mxu1 %v2952_v25 }
  0xb9   :  { %901 = vmatpush1.bf16.msra.mxu1 %v2964_v53 }
  0xba   :  { %902 = vmatprep.subr.bf16.mxu1 %v2969_v50 }
  0xbd   :  { %903 = vmatpush1.bf16.msra.mxu1 %v2984_v39 }
  0xbe   :  { %904 = vmatprep.subr.bf16.mxu1 %v2991_v48 }
  0xc1   :  { %905 = vmatpush1.bf16.msra.mxu1 %v2994_v49 }
  0xc2   :  { %906 = vmatprep.subr.bf16.mxu1 %v2998_v23 }
  0xc5   :  { %907 = vmatpush1.bf16.msra.mxu1 %v3023_v30 }
  0xc6   :  { %908 = vmatprep.subr.bf16.mxu1 %v3015_v41 }
  0xc9   :  { %909 = vmatpush1.bf16.msra.mxu1 %v3025_v26 }
  0xca   :  { %984 = vmatprep.subr.bf16.mxu1 %v2854_v1 }
 0x13e   :  { %v522_v47 = vpop.f32.mrb[0].mxu0 }
 0x13f   :  { %v524_v52 = vpop.f32.mrb[1].mxu0  ;;  %v523_v27 = vadd.f32 %v522_v47, %v438_v7 }
 0x140   :  { %v3107_v33 = vadd.f32 %v524_v52, %v442_v6  ;;  %v526_v57 = vpop.f32.mrb[2].mxu0 }
 0x141   :  { %v3109_v55 = vadd.f32 %v526_v57, %v438_v7  ;;  %v528_v1 = vpop.f32.mrb[3].mxu0 }
 0x142   :  { %v3111_v60 = vadd.f32 %v528_v1, %v442_v6 }
 0x14a   :  { %v532_v62 = vpop.f32.mrb[4].mxu0 }
 0x14b   :  { %v3113_v63 = vadd.f32 %v532_v62, %v438_v7  ;;  %v534_v58 = vpop.f32.mrb[5].mxu0 }
 0x14c   :  { %v3115_v13 = vadd.f32 %v534_v58, %v442_v6  ;;  %v536_v15 = vpop.f32.mrb[6].mxu0 }
 0x14d   :  { %v3117_v19 = vadd.f32 %v536_v15, %v438_v7  ;;  %v538_v21 = vpop.f32.mrb[7].mxu0  ;;  %v3139_v15 = vld [vmem:[#allocation10] ss:$8 sps:$4 sm:$0xff]  }
 0x14e   :  { %v3119_v17 = vadd.f32 %v538_v21, %v442_v6  ;;  %v3148_v21 = vld [vmem:[#allocation10 + $0x24] ss:$8 sps:$4 sm:$0xff]  }
 0x156   :  { %v542_v24 = vpop.f32.mrb[8].mxu0 }
 0x157   :  { %v3121_v22 = vadd.f32 %v542_v24, %v438_v7  ;;  %v544_v29 = vpop.f32.mrb[9].mxu0  ;;  %v3151_v24 = vld [vmem:[#allocation10 + $0x20] ss:$8 sps:$4 sm:$0xff]  }
 0x158   :  { %v3123_v28 = vadd.f32 %v544_v29, %v442_v6  ;;  %v546_v32 = vpop.f32.mrb[10].mxu0  ;;  %v3154_v29 = vld [vmem:[#allocation10 + $0x34] ss:$8 sps:$4 sm:$0xff]  }
 0x159   :  { %v3125_v9 = vadd.f32 %v546_v32, %v438_v7  ;;  %v548_v36 = vpop.f32.mrb[11].mxu0 }
 0x15a   :  { %v3127_v42 = vadd.f32 %v548_v36, %v442_v6 }
 0x15f   :  { %v806_v37 = vpop.f32.mrb[0].mxu1 }
 0x160   :  { %v813_v10 = vadd.f32 %v806_v37, %v523_v27  ;;  %v808_v44 = vpop.f32.mrb[1].mxu1 }
 0x161   :  { %v810_v45 = vpop.f32.mrb[2].mxu1 }
 0x162   :  { %v811_v16 = vpop.f32.mrb[3].mxu1  ;;  %v552_v35 = vpop.f32.mrb[12].mxu0  ;;  %2568 = vtanh.f32 %v813_v10  ;;  %v3201_v45 = vld [vmem:[#allocation10 + $0x44] ss:$8 sps:$4 sm:$0xff]  }
 0x163   :  { %v3129_v40 = vadd.f32 %v552_v35, %v438_v7  ;;  %v554_v46 = vpop.f32.mrb[13].mxu0  ;;  %v3204_v16 = vld [vmem:[#allocation10 + $0x40] ss:$8 sps:$4 sm:$0xff]   ;;  %v3207_v35 = vld [vmem:[#allocation10 + $0x54] ss:$8 sps:$4 sm:$0xff]  }
 0x164   :  { %v555_v0 = vadd.f32 %v554_v46, %v442_v6  ;;  %v556_v3 = vpop.f32.mrb[14].mxu0  ;;  %v3210_v46 = vld [vmem:[#allocation10 + $0x50] ss:$8 sps:$4 sm:$0xff]  }
 0x165   :  { %v3131_v4 = vadd.f32 %v556_v3, %v438_v7  ;;  %v558_v5 = vpop.f32.mrb[15].mxu0  ;;  %v3142_v7 = vld [vmem:[#allocation10 + $0x14] ss:$8 sps:$4 sm:$0xff]  }
 0x166   :  { %v559_v47 = vadd.f32 %v558_v5, %v442_v6  ;;  %v3145_v6 = vld [vmem:[#allocation10 + $0x10] ss:$8 sps:$4 sm:$0xff]  }
 0x168   :  { %v814_v52 = vadd.f32 %v808_v44, %v559_v47 }
 0x16a   :  { %2570 = vtanh.f32 %v814_v52 }
 0x16c   :  { %v2569_v57 = vpop.eup %2568 }
 0x16d   :  { %v3135_v58 = vpack.c.bf16 %v2569_v57, %v2569_v57 }
 0x174   :  { %v2571_v1 = vpop.eup %2570 }
 0x175   :  { %v3133_v62 = vpack.c.bf16 %v2571_v1, %v2571_v1  ;;  %v3259_v1 = vld [vmem:[#allocation10 + $0x74] ss:$8 sps:$4 sm:$0xff]  }
 0x177   :  { %857 = vmatprep.mubr.bf16.mxu0 %v3133_v62 }
 0x178   :  { %858 = vmatmul.mubr.bf16.vlgmr.msra.gmra.mrb[16].mxu0 %v3135_v58 }
 0x179   :  { %932 = vmatpush1.bf16.msra.mxu0 %v3139_v15 }
 0x17a   :  { %933 = vmatprep.subr.bf16.mxu0 %v3142_v7 }
 0x17d   :  { %934 = vmatpush1.bf16.msra.mxu0 %v3145_v6 }
 0x17e   :  { %935 = vmatprep.subr.bf16.mxu0 %v3148_v21 }
 0x181   :  { %936 = vmatpush1.bf16.msra.mxu0 %v3151_v24 }
 0x182   :  { %937 = vmatprep.subr.bf16.mxu0 %v3154_v29 }
 0x185   :  { %938 = vmatpush1.bf16.msra.mxu0 %v2874_v8  ;;  %v3182_v8 = vld [vmem:[#allocation10 + $0x4] ss:$8 sps:$4 sm:$0xff]  }
 0x186   :  { %939 = vmatprep.subr.bf16.mxu0 %v2877_v11 }
 0x189   :  { %940 = vmatpush1.bf16.msra.mxu0 %v2879_v14 }
 0x18a   :  { %941 = vmatprep.subr.bf16.mxu0 %v2881_v18 }
 0x18d   :  { %942 = vmatpush1.bf16.msra.mxu0 %v2888_v38 }
 0x18e   :  { %943 = vmatprep.subr.bf16.mxu0 %v2894_v56 }
 0x191   :  { %944 = vmatpush1.bf16.msra.mxu0 %v2897_v61 }
 0x192   :  { %945 = vmatprep.subr.bf16.mxu0 %v2900_v12 }
 0x195   :  { %946 = vmatpush1.bf16.msra.mxu0 %v2909_v34 }
 0x196   :  { %947 = vmatprep.subr.bf16.mxu0 %v2912_v43 }
 0x199   :  { %948 = vmatpush1.bf16.msra.mxu0 %v2884_v31 }
 0x19a   :  { %949 = vmatprep.subr.bf16.mxu0 %v2924_v20 }
 0x19d   :  { %950 = vmatpush1.bf16.msra.mxu0 %v2938_v51 }
 0x19e   :  { %951 = vmatprep.subr.bf16.mxu0 %v2945_v59 }
 0x1a1   :  { %952 = vmatpush1.bf16.msra.mxu0 %v2942_v54 }
 0x1a2   :  { %953 = vmatprep.subr.bf16.mxu0 %v2952_v25 }
 0x1a5   :  { %954 = vmatpush1.bf16.msra.mxu0 %v2964_v53 }
 0x1a6   :  { %955 = vmatprep.subr.bf16.mxu0 %v2969_v50 }
 0x1a9   :  { %956 = vmatpush1.bf16.msra.mxu0 %v2984_v39 }
 0x1aa   :  { %957 = vmatprep.subr.bf16.mxu0 %v2991_v48 }
 0x1ad   :  { %958 = vmatpush1.bf16.msra.mxu0 %v2994_v49 }
 0x1ae   :  { %959 = vmatprep.subr.bf16.mxu0 %v2998_v23 }
 0x1b1   :  { %960 = vmatpush1.bf16.msra.mxu0 %v3023_v30 }
 0x1b2   :  { %961 = vmatprep.subr.bf16.mxu0 %v3015_v41 }
 0x1b5   :  { %962 = vmatpush1.bf16.msra.mxu0 %v3025_v26 }
 0x1b6   :  { %1037 = vmatprep.subr.bf16.mxu0 %v3182_v8 }
 0x24b   :  { %v859_v11 = vpop.f32.mrb[16].mxu0 }
 0x24c   :  { %v866_v14 = vadd.f32 %v859_v11, %v3109_v55  ;;  %v861_v18 = vpop.f32.mrb[17].mxu0  ;;  %v3198_v55 = vld [vmem:[#allocation10 + $0x30] ss:$8 sps:$4 sm:$0xff]  }
 0x24d   :  { %v867_v38 = vadd.f32 %v861_v18, %v555_v0  ;;  %v863_v27 = vpop.f32.mrb[18].mxu0  ;;  %v3262_v11 = vld [vmem:[#allocation10 + $0x70] ss:$8 sps:$4 sm:$0xff]  }
 0x24e   :  { %2572 = vtanh.f32 %v866_v14  ;;  %v864_v32 = vpop.f32.mrb[19].mxu0 }
 0x24f   :  { %2574 = vtanh.f32 %v867_v38 }
 0x258   :  { %v2573_v36 = vpop.eup %2572 }
 0x259   :  { %v2575_v37 = vpop.eup %2574  ;;  %v3188_v44 = vpack.c.bf16 %v2573_v36, %v2573_v36 }
 0x25a   :  { %v3186_v10 = vpack.c.bf16 %v2575_v37, %v2575_v37 }
 0x25c   :  { %910 = vmatprep.mubr.bf16.mxu1 %v3186_v10 }
 0x25d   :  { %911 = vmatmul.mubr.bf16.vlgmr.msra.gmra.mrb[4].mxu1 %v3188_v44 }
 0x25e   :  { %985 = vmatpush1.bf16.msra.mxu1 %v3139_v15 }
 0x25f   :  { %986 = vmatprep.subr.bf16.mxu1 %v3142_v7 }
 0x262   :  { %987 = vmatpush1.bf16.msra.mxu1 %v3145_v6 }
 0x263   :  { %988 = vmatprep.subr.bf16.mxu1 %v3148_v21 }
 0x266   :  { %989 = vmatpush1.bf16.msra.mxu1 %v3151_v24 }
 0x267   :  { %990 = vmatprep.subr.bf16.mxu1 %v3154_v29 }
 0x26a   :  { %991 = vmatpush1.bf16.msra.mxu1 %v3198_v55 }
 0x26b   :  { %992 = vmatprep.subr.bf16.mxu1 %v3201_v45 }
 0x26e   :  { %993 = vmatpush1.bf16.msra.mxu1 %v3204_v16 }
 0x26f   :  { %994 = vmatprep.subr.bf16.mxu1 %v3207_v35 }
 0x272   :  { %995 = vmatpush1.bf16.msra.mxu1 %v3210_v46 }
 0x273   :  { %996 = vmatprep.subr.bf16.mxu1 %v2894_v56 }
 0x276   :  { %997 = vmatpush1.bf16.msra.mxu1 %v2897_v61 }
 0x277   :  { %998 = vmatprep.subr.bf16.mxu1 %v2900_v12 }
 0x27a   :  { %999 = vmatpush1.bf16.msra.mxu1 %v2909_v34 }
 0x27b   :  { %1000 = vmatprep.subr.bf16.mxu1 %v2912_v43 }
 0x27e   :  { %1001 = vmatpush1.bf16.msra.mxu1 %v2884_v31 }
 0x27f   :  { %1002 = vmatprep.subr.bf16.mxu1 %v2924_v20 }
 0x282   :  { %1003 = vmatpush1.bf16.msra.mxu1 %v2938_v51 }
 0x283   :  { %1004 = vmatprep.subr.bf16.mxu1 %v2945_v59 }
 0x286   :  { %1005 = vmatpush1.bf16.msra.mxu1 %v2942_v54 }
 0x287   :  { %1006 = vmatprep.subr.bf16.mxu1 %v2952_v25 }
 0x28a   :  { %1007 = vmatpush1.bf16.msra.mxu1 %v2964_v53 }
 0x28b   :  { %1008 = vmatprep.subr.bf16.mxu1 %v2969_v50 }
 0x28e   :  { %1009 = vmatpush1.bf16.msra.mxu1 %v2984_v39 }
 0x28f   :  { %1010 = vmatprep.subr.bf16.mxu1 %v2991_v48 }
 0x292   :  { %1011 = vmatpush1.bf16.msra.mxu1 %v2994_v49 }
 0x293   :  { %1012 = vmatprep.subr.bf16.mxu1 %v2998_v23 }
 0x296   :  { %1013 = vmatpush1.bf16.msra.mxu1 %v3023_v30 }
 0x297   :  { %1014 = vmatprep.subr.bf16.mxu1 %v3015_v41 }
 0x29a   :  { %1015 = vmatpush1.bf16.msra.mxu1 %v3025_v26 }
 0x29b   :  { %1090 = vmatprep.subr.bf16.mxu1 %v3182_v8 }
 0x330   :  { %v912_v56 = vpop.f32.mrb[4].mxu1 }
 0x331   :  { %v919_v61 = vadd.f32 %v912_v56, %v3113_v63  ;;  %v914_v12 = vpop.f32.mrb[5].mxu1  ;;  %v3253_v63 = vld [vmem:[#allocation10 + $0x64] ss:$8 sps:$4 sm:$0xff]  }
 0x332   :  { %v920_v34 = vadd.f32 %v914_v12, %v3127_v42  ;;  %v916_v0 = vpop.f32.mrb[6].mxu1  ;;  %v3256_v42 = vld [vmem:[#allocation10 + $0x60] ss:$8 sps:$4 sm:$0xff]  }
 0x333   :  { %2576 = vtanh.f32 %v919_v61  ;;  %v917_v3 = vpop.f32.mrb[7].mxu1 }
 0x334   :  { %2578 = vtanh.f32 %v920_v34 }
 0x33d   :  { %v2577_v5 = vpop.eup %2576 }
 0x33e   :  { %v2579_v47 = vpop.eup %2578  ;;  %v3238_v57 = vpack.c.bf16 %v2577_v5, %v2577_v5 }
 0x33f   :  { %v3236_v52 = vpack.c.bf16 %v2579_v47, %v2579_v47  ;;  %v3401_v47 = vld [vmem:[#allocation11 + $0x30] sm:$0xff]  }
 0x341   :  { %963 = vmatprep.mubr.bf16.mxu0 %v3236_v52 }
 0x342   :  { %964 = vmatmul.mubr.bf16.vlgmr.msra.gmra.mrb[20].mxu0 %v3238_v57 }
 0x343   :  { %1038 = vmatpush1.bf16.msra.mxu0 %v3139_v15 }
 0x344   :  { %1039 = vmatprep.subr.bf16.mxu0 %v3142_v7 }
 0x347   :  { %1040 = vmatpush1.bf16.msra.mxu0 %v3145_v6 }
 0x348   :  { %1041 = vmatprep.subr.bf16.mxu0 %v3148_v21 }
 0x34b   :  { %1042 = vmatpush1.bf16.msra.mxu0 %v3151_v24 }
 0x34c   :  { %1043 = vmatprep.subr.bf16.mxu0 %v3154_v29 }
 0x34f   :  { %1044 = vmatpush1.bf16.msra.mxu0 %v3198_v55 }
 0x350   :  { %1045 = vmatprep.subr.bf16.mxu0 %v3201_v45 }
 0x353   :  { %1046 = vmatpush1.bf16.msra.mxu0 %v3204_v16 }
 0x354   :  { %1047 = vmatprep.subr.bf16.mxu0 %v3207_v35 }
 0x357   :  { %1048 = vmatpush1.bf16.msra.mxu0 %v3210_v46 }
 0x358   :  { %1049 = vmatprep.subr.bf16.mxu0 %v3253_v63 }
 0x35b   :  { %1050 = vmatpush1.bf16.msra.mxu0 %v3256_v42 }
 0x35c   :  { %1051 = vmatprep.subr.bf16.mxu0 %v3259_v1 }
 0x35f   :  { %1052 = vmatpush1.bf16.msra.mxu0 %v3262_v11 }
 0x360   :  { %1053 = vmatprep.subr.bf16.mxu0 %v2912_v43 }
 0x363   :  { %1054 = vmatpush1.bf16.msra.mxu0 %v2884_v31 }
 0x364   :  { %1055 = vmatprep.subr.bf16.mxu0 %v2924_v20 }
 0x367   :  { %1056 = vmatpush1.bf16.msra.mxu0 %v2938_v51 }
 0x368   :  { %1057 = vmatprep.subr.bf16.mxu0 %v2945_v59 }
 0x36b   :  { %1058 = vmatpush1.bf16.msra.mxu0 %v2942_v54 }
 0x36c   :  { %1059 = vmatprep.subr.bf16.mxu0 %v2952_v25 }
 0x36f   :  { %1060 = vmatpush1.bf16.msra.mxu0 %v2964_v53 }
 0x370   :  { %1061 = vmatprep.subr.bf16.mxu0 %v2969_v50 }
 0x373   :  { %1062 = vmatpush1.bf16.msra.mxu0 %v2984_v39 }
 0x374   :  { %1063 = vmatprep.subr.bf16.mxu0 %v2991_v48 }
 0x377   :  { %1064 = vmatpush1.bf16.msra.mxu0 %v2994_v49 }
 0x378   :  { %1065 = vmatprep.subr.bf16.mxu0 %v2998_v23 }
 0x37b   :  { %1066 = vmatpush1.bf16.msra.mxu0 %v3023_v30 }
 0x37c   :  { %1067 = vmatprep.subr.bf16.mxu0 %v3015_v41 }
 0x37f   :  { %1068 = vmatpush1.bf16.msra.mxu0 %v3025_v26 }
 0x380   :  { %1142 = vmatprep.subr.bf16.mxu0 %v3182_v8 }
 0x415   :  { %v965_v43 = vpop.f32.mrb[20].mxu0 }
 0x416   :  { %v972_v20 = vadd.f32 %v965_v43, %v3117_v19  ;;  %v967_v14 = vpop.f32.mrb[21].mxu0  ;;  %v2616_v19 = vld [vmem:[#allocation10 + $0x84] ss:$8 sps:$4 sm:$0xff]  }
 0x417   :  { %v973_v18 = vadd.f32 %v967_v14, %v3123_v28  ;;  %v969_v38 = vpop.f32.mrb[22].mxu0  ;;  %v2617_v28 = vld [vmem:[#allocation10 + $0x94] ss:$8 sps:$4 sm:$0xff]  }
 0x418   :  { %2580 = vtanh.f32 %v972_v20  ;;  %v970_v27 = vpop.f32.mrb[23].mxu0 }
 0x419   :  { %2582 = vtanh.f32 %v973_v18 }
 0x422   :  { %v2581_v32 = vpop.eup %2580 }
 0x423   :  { %v2583_v36 = vpop.eup %2582  ;;  %v3286_v56 = vpack.c.bf16 %v2581_v32, %v2581_v32 }
 0x424   :  { %v3284_v37 = vpack.c.bf16 %v2583_v36, %v2583_v36 }
 0x426   :  { %1016 = vmatprep.mubr.bf16.mxu1 %v3284_v37 }
 0x427   :  { %1017 = vmatmul.mubr.bf16.vlgmr.msra.gmra.mrb[8].mxu1 %v3286_v56 }
 0x428   :  { %1091 = vmatpush1.bf16.msra.mxu1 %v3139_v15 }
 0x429   :  { %1092 = vmatprep.subr.bf16.mxu1 %v3142_v7 }
 0x42c   :  { %1093 = vmatpush1.bf16.msra.mxu1 %v3145_v6 }
 0x42d   :  { %1094 = vmatprep.subr.bf16.mxu1 %v3148_v21 }
 0x430   :  { %1095 = vmatpush1.bf16.msra.mxu1 %v3151_v24 }
 0x431   :  { %1096 = vmatprep.subr.bf16.mxu1 %v3154_v29 }
 0x434   :  { %1097 = vmatpush1.bf16.msra.mxu1 %v3198_v55 }
 0x435   :  { %1098 = vmatprep.subr.bf16.mxu1 %v3201_v45 }
 0x438   :  { %1099 = vmatpush1.bf16.msra.mxu1 %v3204_v16 }
 0x439   :  { %1100 = vmatprep.subr.bf16.mxu1 %v3207_v35 }
 0x43c   :  { %1101 = vmatpush1.bf16.msra.mxu1 %v3210_v46 }
 0x43d   :  { %1102 = vmatprep.subr.bf16.mxu1 %v3253_v63 }
 0x440   :  { %1103 = vmatpush1.bf16.msra.mxu1 %v3256_v42 }
 0x441   :  { %1104 = vmatprep.subr.bf16.mxu1 %v3259_v1 }
 0x444   :  { %1105 = vmatpush1.bf16.msra.mxu1 %v3262_v11 }
 0x445   :  { %1106 = vmatprep.subr.bf16.mxu1 %v2616_v19 }
 0x448   :  { %1107 = vmatpush1.bf16.msra.mxu1 %v2884_v31 }
 0x449   :  { %1108 = vmatprep.subr.bf16.mxu1 %v2617_v28 }
 0x44c   :  { %1109 = vmatpush1.bf16.msra.mxu1 %v2938_v51 }
 0x44d   :  { %1110 = vmatprep.subr.bf16.mxu1 %v2945_v59 }
 0x450   :  { %1111 = vmatpush1.bf16.msra.mxu1 %v2942_v54 }
 0x451   :  { %1112 = vmatprep.subr.bf16.mxu1 %v2952_v25 }
 0x454   :  { %1113 = vmatpush1.bf16.msra.mxu1 %v2964_v53 }
 0x455   :  { %1114 = vmatprep.subr.bf16.mxu1 %v2969_v50 }
 0x458   :  { %1115 = vmatpush1.bf16.msra.mxu1 %v2984_v39 }
 0x459   :  { %1116 = vmatprep.subr.bf16.mxu1 %v2991_v48 }
 0x45c   :  { %1117 = vmatpush1.bf16.msra.mxu1 %v2994_v49 }
 0x45d   :  { %1118 = vmatprep.subr.bf16.mxu1 %v2998_v23 }
 0x460   :  { %1119 = vmatpush1.bf16.msra.mxu1 %v3023_v30 }
 0x461   :  { %1120 = vmatprep.subr.bf16.mxu1 %v3015_v41 }
 0x464   :  { %1121 = vmatpush1.bf16.msra.mxu1 %v3025_v26 }
 0x4fa   :  { %v1018_v51 = vpop.f32.mrb[8].mxu1 }
 0x4fb   :  { %v1025_v59 = vadd.f32 %v1018_v51, %v3121_v22  ;;  %v1020_v25 = vpop.f32.mrb[9].mxu1  ;;  %v2619_v22 = vld [vmem:[#allocation10 + $0xa4] ss:$8 sps:$4 sm:$0xff]  }
 0x4fc   :  { %v1026_v8 = vadd.f32 %v1020_v25, %v3119_v17  ;;  %v1022_v61 = vpop.f32.mrb[10].mxu1  ;;  %v2618_v17 = vld [vmem:[#allocation10 + $0x90] ss:$8 sps:$4 sm:$0xff]  }
 0x4fd   :  { %2584 = vtanh.f32 %v1025_v59  ;;  %v1023_v12 = vpop.f32.mrb[11].mxu1 }
 0x4fe   :  { %2586 = vtanh.f32 %v1026_v8  ;;  %v3500_v8 = vld [vmem:[%s3625_s5] ss:$0 sm:$0xff]  ;;  %s2749_s5 = smov [#allocation13]  }
 0x4ff   :  { %s2209_s25 = sshll.u32 %s2749_s5, 4  ;;  %s2210_s25 = int_to_ptr.vmem [resolvable:$true] %s2209_s25 }
 0x500   :  { %s2709_s26 = scalar_lea.vmem %s2210_s25, 1024  ;;  %p2714_p5 = scmp.lt.s32.totalorder %s2210_s25, %s2210_s25 }
 0x501   :  { %p2710_p4 = scmp.ne.s32.totalorder %s2210_s25, %s2709_s26  ;;  %p2715_p6 = scmp.lt.s32.totalorder %s2709_s26, %s2709_s26 }
 0x503   :  { %p2716_p7 = por %p2715_p6, %p2714_p5 }
 0x505   :  { %p2717_p8 = pnand %p2716_p7, %p2710_p4 }
 0x507   :  { %v2585_v34 = vpop.eup %2584 }
 0x508   :  { %v2587_v0 = vpop.eup %2586  ;;  %v3323_v5 = vpack.c.bf16 %v2585_v34, %v2585_v34 }
 0x509   :  { %v3321_v3 = vpack.c.bf16 %v2587_v0, %v2587_v0 }
 0x50b   :  { %1069 = vmatprep.mubr.bf16.mxu0 %v3321_v3 }
 0x50c   :  { %1070 = vmatmul.mubr.bf16.vlgmr.msra.gmra.mrb[24].mxu0 %v3323_v5 }
 0x50d   :  { %1143 = vmatpush1.bf16.msra.mxu0 %v3139_v15  ;;  %v2620_v15 = vld [vmem:[#allocation10 + $0xb4] ss:$8 sps:$4 sm:$0xff]  }
 0x50e   :  { %1144 = vmatprep.subr.bf16.mxu0 %v3142_v7 }
 0x511   :  { %1145 = vmatpush1.bf16.msra.mxu0 %v3145_v6 }
 0x512   :  { %1146 = vmatprep.subr.bf16.mxu0 %v3148_v21  ;;  %v3377_v21 = vld [vmem:[#allocation11 + $0x10] sm:$0xff]  }
 0x515   :  { %1147 = vmatpush1.bf16.msra.mxu0 %v3151_v24  ;;  %v3379_v24 = vld [vmem:[#allocation11 + $0x58] sm:$0xff]  }
 0x516   :  { %1148 = vmatprep.subr.bf16.mxu0 %v3154_v29  ;;  %v3383_v29 = vld [vmem:[#allocation11 + $0x18] sm:$0xff]  }
 0x519   :  { %1149 = vmatpush1.bf16.msra.mxu0 %v3198_v55  ;;  %v3385_v55 = vld [vmem:[#allocation11 + $0x60] sm:$0xff]  }
 0x51a   :  { %1150 = vmatprep.subr.bf16.mxu0 %v3201_v45  ;;  %v3389_v45 = vld [vmem:[#allocation11 + $0x20] sm:$0xff]  }
 0x51d   :  { %1151 = vmatpush1.bf16.msra.mxu0 %v3204_v16  ;;  %v3391_v16 = vld [vmem:[#allocation11 + $0x68] sm:$0xff]  }
 0x51e   :  { %1152 = vmatprep.subr.bf16.mxu0 %v3207_v35  ;;  %v3395_v35 = vld [vmem:[#allocation11 + $0x28] sm:$0xff]  }
 0x521   :  { %1153 = vmatpush1.bf16.msra.mxu0 %v3210_v46  ;;  %v3397_v46 = vld [vmem:[#allocation11 + $0x70] sm:$0xff]  }
 0x522   :  { %1154 = vmatprep.subr.bf16.mxu0 %v3253_v63  ;;  %v3403_v63 = vld [vmem:[#allocation11 + $0x78] sm:$0xff]  }
 0x525   :  { %1155 = vmatpush1.bf16.msra.mxu0 %v3256_v42  ;;  %v3407_v42 = vld [vmem:[#allocation11 + $0x38] sm:$0xff]  }
 0x526   :  { %1156 = vmatprep.subr.bf16.mxu0 %v3259_v1 }
 0x529   :  { %1157 = vmatpush1.bf16.msra.mxu0 %v3262_v11 }
 0x52a   :  { %1158 = vmatprep.subr.bf16.mxu0 %v2616_v19 }
 0x52d   :  { %1159 = vmatpush1.bf16.msra.mxu0 %v2884_v31 }
 0x52e   :  { %1160 = vmatprep.subr.bf16.mxu0 %v2617_v28 }
 0x531   :  { %1161 = vmatpush1.bf16.msra.mxu0 %v2618_v17 }
 0x532   :  { %1162 = vmatprep.subr.bf16.mxu0 %v2619_v22 }
 0x535   :  { %1163 = vmatpush1.bf16.msra.mxu0 %v2942_v54 }
 0x536   :  { %1164 = vmatprep.subr.bf16.mxu0 %v2620_v15 }
 0x539   :  { %1165 = vmatpush1.bf16.msra.mxu0 %v2964_v53 }
 0x53a   :  { %1166 = vmatprep.subr.bf16.mxu0 %v2969_v50 }
 0x53d   :  { %1167 = vmatpush1.bf16.msra.mxu0 %v2984_v39 }
 0x53e   :  { %1168 = vmatprep.subr.bf16.mxu0 %v2991_v48 }
 0x541   :  { %1169 = vmatpush1.bf16.msra.mxu0 %v2994_v49 }
 0x542   :  { %1170 = vmatprep.subr.bf16.mxu0 %v2998_v23 }
 0x545   :  { %1171 = vmatpush1.bf16.msra.mxu0 %v3023_v30  ;;  %v3363_v30 = vld [vmem:[#allocation11] sm:$0xff]  }
 0x546   :  { %1172 = vmatprep.subr.bf16.mxu0 %v3015_v41  ;;  %v3361_v41 = vld [vmem:[#allocation11 + $0x40] sm:$0xff]  }
 0x547   :  { %2314 = vmatprep.subr.bf16.mxu1 %v3361_v41 }
 0x549   :  { %1173 = vmatpush1.bf16.msra.mxu0 %v3025_v26  ;;  %v3366_v26 = vld [vmem:[#allocation11 + $0x48] sm:$0xff]  }
 0x54a   :  { %2336 = vmatprep.subr.bf16.mxu0 %v3361_v41 }
 0x5df   :  { %v1071_v31 = vpop.f32.mrb[24].mxu0 }
 0x5e0   :  { %v1078_v54 = vadd.f32 %v1071_v31, %v3125_v9  ;;  %v1073_v53 = vpop.f32.mrb[25].mxu0  ;;  %v3373_v9 = vld [vmem:[#allocation11 + $0x50] sm:$0xff]  }
 0x5e1   :  { %v1079_v50 = vadd.f32 %v1073_v53, %v3115_v13  ;;  %v1075_v7 = vpop.f32.mrb[26].mxu0  ;;  %v3371_v13 = vld [vmem:[#allocation11 + $0x8] sm:$0xff]  }
 0x5e2   :  { %2588 = vtanh.f32 %v1078_v54  ;;  %v1076_v39 = vpop.f32.mrb[27].mxu0 }
 0x5e3   :  { %2590 = vtanh.f32 %v1079_v50 }
 0x5ec   :  { %v2589_v48 = vpop.eup %2588 }
 0x5ed   :  { %v2591_v49 = vpop.eup %2590  ;;  %v3357_v23 = vpack.c.bf16 %v2589_v48, %v2589_v48 }
 0x5ee   :  { %v3355_v6 = vpack.c.bf16 %v2591_v49, %v2591_v49 }
 0x5f0   :  { %1122 = vmatprep.mubr.bf16.mxu1 %v3355_v6 }
 0x5f1   :  { %1123 = vmatmul.mubr.bf16.vlgmr.msra.gmra.mrb[12].mxu1 %v3357_v23 }
 0x5f2   :  { %2315 = vmatpush3.bf16.msra.mxu1 %v3363_v30 }
 0x5f3   :  { %2316 = vmatprep.subr.bf16.mxu1 %v3366_v26 }
 0x5f6   :  { %2317 = vmatpush3.bf16.msra.mxu1 %v3371_v13 }
 0x5f7   :  { %2318 = vmatprep.subr.bf16.mxu1 %v3373_v9 }
 0x5fa   :  { %2319 = vmatpush3.bf16.msra.mxu1 %v3377_v21 }
 0x5fb   :  { %2320 = vmatprep.subr.bf16.mxu1 %v3379_v24 }
 0x5fe   :  { %2321 = vmatpush3.bf16.msra.mxu1 %v3383_v29 }
 0x5ff   :  { %2322 = vmatprep.subr.bf16.mxu1 %v3385_v55 }
 0x602   :  { %2323 = vmatpush3.bf16.msra.mxu1 %v3389_v45 }
 0x603   :  { %2324 = vmatprep.subr.bf16.mxu1 %v3391_v16 }
 0x606   :  { %2325 = vmatpush3.bf16.msra.mxu1 %v3395_v35 }
 0x607   :  { %2326 = vmatprep.subr.bf16.mxu1 %v3397_v46 }
 0x60a   :  { %2327 = vmatpush3.bf16.msra.mxu1 %v3401_v47 }
 0x60b   :  { %2328 = vmatprep.subr.bf16.mxu1 %v3403_v63 }
 0x60e   :  { %2329 = vmatpush3.bf16.msra.mxu1 %v3407_v42 }
 0x60f   :  { %2358 = vmatprep.subr.bf16.mxu1 %v3361_v41 }
 0x6c4   :  { %v1124_v1 = vpop.f32.mrb[12].mxu1 }
 0x6c5   :  { %v1131_v11 = vadd.f32 %v1124_v1, %v3129_v40  ;;  %v1126_v43 = vpop.f32.mrb[13].mxu1 }
 0x6c6   :  { %v1132_v20 = vadd.f32 %v1126_v43, %v3111_v60  ;;  %v1128_v14 = vpop.f32.mrb[14].mxu1 }
 0x6c7   :  { %2592 = vtanh.f32 %v1131_v11  ;;  %v1129_v18 = vpop.f32.mrb[15].mxu1 }
 0x6c8   :  { %2594 = vtanh.f32 %v1132_v20 }
 0x6d1   :  { %v2593_v38 = vpop.eup %2592 }
 0x6d2   :  { %v2595_v27 = vpop.eup %2594  ;;  %v3413_v36 = vpack.c.bf16 %v2593_v38, %v2593_v38 }
 0x6d3   :  { %v1141_v32 = vpack.c.bf16 %v2595_v27, %v2595_v27 }
 0x6d5   :  { %1174 = vmatprep.mubr.bf16.mxu0 %v1141_v32 }
 0x6d6   :  { %1175 = vmatmul.mubr.bf16.vlgmr.msra.gmra.mrb[28].mxu0 %v3413_v36 }
 0x6d7   :  { %2337 = vmatpush3.bf16.msra.mxu0 %v3363_v30  ;;  %1470 = vmatprep.mubr.bf16.mxu0 %v1141_v32 }
 0x6d8   :  { %2338 = vmatprep.subr.bf16.mxu0 %v3366_v26 }
 0x6db   :  { %2339 = vmatpush3.bf16.msra.mxu0 %v3371_v13 }
 0x6dc   :  { %2340 = vmatprep.subr.bf16.mxu0 %v3373_v9 }
 0x6df   :  { %2341 = vmatpush3.bf16.msra.mxu0 %v3377_v21 }
 0x6e0   :  { %2342 = vmatprep.subr.bf16.mxu0 %v3379_v24 }
 0x6e3   :  { %2343 = vmatpush3.bf16.msra.mxu0 %v3383_v29 }
 0x6e4   :  { %2344 = vmatprep.subr.bf16.mxu0 %v3385_v55 }
 0x6e7   :  { %2345 = vmatpush3.bf16.msra.mxu0 %v3389_v45 }
 0x6e8   :  { %2346 = vmatprep.subr.bf16.mxu0 %v3391_v16 }
 0x6eb   :  { %2347 = vmatpush3.bf16.msra.mxu0 %v3395_v35 }
 0x6ec   :  { %2348 = vmatprep.subr.bf16.mxu0 %v3397_v46 }
 0x6ef   :  { %2349 = vmatpush3.bf16.msra.mxu0 %v3401_v47 }
 0x6f0   :  { %2350 = vmatprep.subr.bf16.mxu0 %v3403_v63 }
 0x6f3   :  { %2351 = vmatpush3.bf16.msra.mxu0 %v3407_v42 }
 0x6f4   :  { %2380 = vmatprep.subr.bf16.mxu0 %v3361_v41 }
 0x6f6   :  { %1471 = vmatmul.mubr.bf16.vlgmr.msra.gmra.mrb[32].mxu0 %v3188_v44 }
 0x6f7   :  { %2381 = vmatpush3.bf16.msra.mxu0 %v3363_v30  ;;  %1690 = vmatprep.mubr.bf16.mxu0 %v3321_v3 }
 0x6f8   :  { %2382 = vmatprep.subr.bf16.mxu0 %v3366_v26 }
 0x6fb   :  { %2383 = vmatpush3.bf16.msra.mxu0 %v3371_v13 }
 0x6fc   :  { %2384 = vmatprep.subr.bf16.mxu0 %v3373_v9 }
 0x6ff   :  { %2385 = vmatpush3.bf16.msra.mxu0 %v3377_v21 }
 0x700   :  { %2386 = vmatprep.subr.bf16.mxu0 %v3379_v24 }
 0x703   :  { %2387 = vmatpush3.bf16.msra.mxu0 %v3383_v29 }
 0x704   :  { %2388 = vmatprep.subr.bf16.mxu0 %v3385_v55 }
 0x707   :  { %2389 = vmatpush3.bf16.msra.mxu0 %v3389_v45 }
 0x708   :  { %2390 = vmatprep.subr.bf16.mxu0 %v3391_v16 }
 0x70b   :  { %2391 = vmatpush3.bf16.msra.mxu0 %v3395_v35 }
 0x70c   :  { %2392 = vmatprep.subr.bf16.mxu0 %v3397_v46 }
 0x70f   :  { %2393 = vmatpush3.bf16.msra.mxu0 %v3401_v47 }
 0x710   :  { %2394 = vmatprep.subr.bf16.mxu0 %v3403_v63 }
 0x713   :  { %2395 = vmatpush3.bf16.msra.mxu0 %v3407_v42 }
 0x714   :  { %2424 = vmatprep.subr.bf16.mxu0 %v3361_v41 }
 0x716   :  { %1691 = vmatmul.mubr.bf16.vlgmr.msra.gmra.mrb[36].mxu0 %v3286_v56 }
 0x717   :  { %2425 = vmatpush3.bf16.msra.mxu0 %v3363_v30  ;;  %1910 = vmatprep.mubr.bf16.mxu0 %v3236_v52 }
 0x718   :  { %2426 = vmatprep.subr.bf16.mxu0 %v3366_v26 }
 0x71b   :  { %2427 = vmatpush3.bf16.msra.mxu0 %v3371_v13 }
 0x71c   :  { %2428 = vmatprep.subr.bf16.mxu0 %v3373_v9 }
 0x71f   :  { %2429 = vmatpush3.bf16.msra.mxu0 %v3377_v21 }
 0x720   :  { %2430 = vmatprep.subr.bf16.mxu0 %v3379_v24 }
 0x723   :  { %2431 = vmatpush3.bf16.msra.mxu0 %v3383_v29 }
 0x724   :  { %2432 = vmatprep.subr.bf16.mxu0 %v3385_v55 }
 0x727   :  { %2433 = vmatpush3.bf16.msra.mxu0 %v3389_v45 }
 0x728   :  { %2434 = vmatprep.subr.bf16.mxu0 %v3391_v16 }
 0x72b   :  { %2435 = vmatpush3.bf16.msra.mxu0 %v3395_v35 }
 0x72c   :  { %2436 = vmatprep.subr.bf16.mxu0 %v3397_v46 }
 0x72f   :  { %2437 = vmatpush3.bf16.msra.mxu0 %v3401_v47 }
 0x730   :  { %2438 = vmatprep.subr.bf16.mxu0 %v3403_v63 }
 0x733   :  { %2439 = vmatpush3.bf16.msra.mxu0 %v3407_v42 }
 0x734   :  { %2468 = vmatprep.subr.bf16.mxu0 %v3361_v41 }
 0x736   :  { %1911 = vmatmul.mubr.bf16.vlgmr.msra.gmra.mrb[40].mxu0 %v3357_v23 }
 0x737   :  { %2130 = vmatprep.mubr.bf16.mxu0 %v3133_v62  ;;  %2469 = vmatpush3.bf16.msra.mxu0 %v3363_v30 }
 0x738   :  { %2470 = vmatprep.subr.bf16.mxu0 %v3366_v26 }
 0x73b   :  { %2471 = vmatpush3.bf16.msra.mxu0 %v3371_v13 }
 0x73c   :  { %2472 = vmatprep.subr.bf16.mxu0 %v3373_v9 }
 0x73f   :  { %2473 = vmatpush3.bf16.msra.mxu0 %v3377_v21 }
 0x740   :  { %2474 = vmatprep.subr.bf16.mxu0 %v3379_v24 }
 0x743   :  { %2475 = vmatpush3.bf16.msra.mxu0 %v3383_v29 }
 0x744   :  { %2476 = vmatprep.subr.bf16.mxu0 %v3385_v55 }
 0x747   :  { %2477 = vmatpush3.bf16.msra.mxu0 %v3389_v45 }
 0x748   :  { %2478 = vmatprep.subr.bf16.mxu0 %v3391_v16 }
 0x74b   :  { %2479 = vmatpush3.bf16.msra.mxu0 %v3395_v35 }
 0x74c   :  { %2480 = vmatprep.subr.bf16.mxu0 %v3397_v46 }
 0x74f   :  { %2481 = vmatpush3.bf16.msra.mxu0 %v3401_v47 }
 0x750   :  { %2482 = vmatprep.subr.bf16.mxu0 %v3403_v63 }
 0x753   :  { %2483 = vmatpush3.bf16.msra.mxu0 %v3407_v42 }
 0x7a9   :  { %v1176_v60 = vpop.f32.mrb[28].mxu0 }
 0x7aa   :  { %v1183_v40 = vadd.f32 %v1176_v60, %v3131_v4  ;;  %v1178_v62 = vpop.f32.mrb[29].mxu0 }
 0x7ab   :  { %v1184_v44 = vadd.f32 %v1178_v62, %v3107_v33  ;;  %v1180_v52 = vpop.f32.mrb[30].mxu0  ;;  %v2748_v33 = vmov 1966171168  }
 0x7ac   :  { %2596 = vtanh.f32 %v1183_v40  ;;  %v1181_v56 = vpop.f32.mrb[31].mxu0  ;;  %v1371_v4 = vunpack.c.l.s4 %v2748_v33 }
 0x7ad   :  { %2598 = vtanh.f32 %v1184_v44 }
 0x7ae   :  { %v1372_v25 = vunpack.c.0.s8 %v1371_v4 }
 0x7b0   :  { %v3503_v12 = vsub.s32 %v1372_v25, %v3100_v2 }
 0x7b6   :  { %v2597_v19 = vpop.eup %2596 }
 0x7b7   :  { %v2599_v28 = vpop.eup %2598  ;;  %v2096_v51 = vpack.c.bf16 %v2597_v19, %v2597_v19 }
 0x7b8   :  { %v1225_v59 = vpack.c.bf16 %v2599_v28, %v2599_v28 }
 0x7b9   :  { %2131 = vmatmul.mubr.bf16.vlgmr.msra.gmra.mrb[44].mxu0 %v2096_v51 }
 0x7ba   :  { %1360 = vmatprep.mubr.bf16.mxu1 %v1225_v59 }
 0x7bb   :  { %1361 = vmatmul.mubr.bf16.vlgmr.msra.gmra.mrb[16].mxu1 %v3135_v58 }
 0x7bc   :  { %2359 = vmatpush3.bf16.msra.mxu1 %v3363_v30  ;;  %1580 = vmatprep.mubr.bf16.mxu1 %v3355_v6 }
 0x7bd   :  { %2360 = vmatprep.subr.bf16.mxu1 %v3366_v26 }
 0x7c0   :  { %2361 = vmatpush3.bf16.msra.mxu1 %v3371_v13 }
 0x7c1   :  { %2362 = vmatprep.subr.bf16.mxu1 %v3373_v9 }
 0x7c4   :  { %2363 = vmatpush3.bf16.msra.mxu1 %v3377_v21 }
 0x7c5   :  { %2364 = vmatprep.subr.bf16.mxu1 %v3379_v24 }
 0x7c8   :  { %2365 = vmatpush3.bf16.msra.mxu1 %v3383_v29 }
 0x7c9   :  { %v2352_v58 = vpop.f32.mrb[32].mxu0  ;;  %2366 = vmatprep.subr.bf16.mxu1 %v3385_v55 }
 0x7ca   :  { %v2353_v61 = vpop.f32.mrb[33].mxu0 }
 0x7cb   :  { %v2354_v34 = vadd.f32 %v2353_v61, %v2352_v58  ;;  %v2355_v0 = vpop.f32.mrb[34].mxu0 }
 0x7cc   :  { %v2356_v3 = vpop.f32.mrb[35].mxu0  ;;  %2367 = vmatpush3.bf16.msra.mxu1 %v3389_v45 }
 0x7cd   :  { %v1473_v17 = vadd.f32 %v2354_v34, %v3500_v8  ;;  %2368 = vmatprep.subr.bf16.mxu1 %v3391_v16 }
 0x7cf   :  { %v1479_v22 = vcombine.high %v1473_v17, %v1473_v17  ;;  %v1486_v15 = vrot.slane %v1473_v17, %v3503_v12 }
 0x7d0   :  { %2369 = vmatpush3.bf16.msra.mxu1 %v3395_v35 }
 0x7d1   :  { %v1493_v31 = vrot.slane %v1479_v22, %v3503_v12  ;;  %v1494_v54 = vcombine.high %v1486_v15, %v1486_v15  ;;  %v1502_v2 = vrot.slane %v1486_v15, %v3503_v12  ;;  %2286 = vst.sshfl [vmem:[#allocation13 + $0x1] sm:$0x1 pattern:$0x73625140] %v1486_v15  ;;  %2370 = vmatprep.subr.bf16.mxu1 %v3397_v46 }
 0x7d3   :  { %v1495_v53 = vcombine.high %v1493_v31, %v1493_v31  ;;  %v1509_v50 = vrot.slane %v1493_v31, %v3503_v12  ;;  %v1516_v7 = vrot.slane %v1494_v54, %v3503_v12  ;;  %v1524_v39 = vcombine.high %v1502_v2, %v1502_v2  ;;  %2287 = vst.sshfl [vmem:[#allocation13 + $0x9] sm:$0x1 pattern:$0x73625140] %v1494_v54 }
 0x7d4   :  { %2288 = vst.sshfl [vmem:[#allocation13 + $0x21] sm:$0x1 pattern:$0x73625140] %v1493_v31  ;;  %2371 = vmatpush3.bf16.msra.mxu1 %v3401_v47 }
 0x7d5   :  { %v1523_v48 = vrot.slane %v1495_v53, %v3503_v12  ;;  %v1525_v49 = vcombine.high %v1509_v50, %v1509_v50  ;;  %v1526_v6 = vcombine.high %v1516_v7, %v1516_v7  ;;  %1538 = vst [vmem:[#allocation13 + $0x11] sm:$0x1] %v1524_v39  ;;  %2289 = vst.sshfl [vmem:[#allocation13 + $0x29] sm:$0x1 pattern:$0x73625140] %v1495_v53  ;;  %2372 = vmatprep.subr.bf16.mxu1 %v3403_v63 }
 0x7d7   :  { %v1527_v23 = vcombine.high %v1523_v48, %v1523_v48  ;;  %1539 = vst [vmem:[#allocation13 + $0x19] sm:$0x1] %v1526_v6  ;;  %1542 = vst [vmem:[#allocation13 + $0x31] sm:$0x1] %v1525_v49 }
 0x7d8   :  { %2373 = vmatpush3.bf16.msra.mxu1 %v3407_v42 }
 0x7d9   :  { %1543 = vst [vmem:[#allocation13 + $0x39] sm:$0x1] %v1527_v23  ;;  %2402 = vmatprep.subr.bf16.mxu1 %v3361_v41 }
 0x7db   :  { %1581 = vmatmul.mubr.bf16.vlgmr.msra.gmra.mrb[20].mxu1 %v3238_v57 }
 0x7dc   :  { %2403 = vmatpush3.bf16.msra.mxu1 %v3363_v30  ;;  %1800 = vmatprep.mubr.bf16.mxu1 %v3284_v37 }
 0x7dd   :  { %2404 = vmatprep.subr.bf16.mxu1 %v3366_v26 }
 0x7e0   :  { %2405 = vmatpush3.bf16.msra.mxu1 %v3371_v13 }
 0x7e1   :  { %2406 = vmatprep.subr.bf16.mxu1 %v3373_v9 }
 0x7e4   :  { %2407 = vmatpush3.bf16.msra.mxu1 %v3377_v21 }
 0x7e5   :  { %2408 = vmatprep.subr.bf16.mxu1 %v3379_v24 }
 0x7e8   :  { %2409 = vmatpush3.bf16.msra.mxu1 %v3383_v29 }
 0x7e9   :  { %v2396_v1 = vpop.f32.mrb[36].mxu0  ;;  %2410 = vmatprep.subr.bf16.mxu1 %v3385_v55 }
 0x7ea   :  { %v2397_v57 = vpop.f32.mrb[37].mxu0 }
 0x7eb   :  { %v2398_v11 = vadd.f32 %v2397_v57, %v2396_v1  ;;  %v2399_v43 = vpop.f32.mrb[38].mxu0 }
 0x7ec   :  { %v2400_v20 = vpop.f32.mrb[39].mxu0  ;;  %2411 = vmatpush3.bf16.msra.mxu1 %v3389_v45 }
 0x7ed   :  { %v1693_v37 = vadd.f32 %v2398_v11, %v3500_v8  ;;  %2412 = vmatprep.subr.bf16.mxu1 %v3391_v16 }
 0x7ef   :  { %v1699_v14 = vcombine.high %v1693_v37, %v1693_v37  ;;  %v1706_v18 = vrot.slane %v1693_v37, %v3503_v12 }
 0x7f0   :  { %2413 = vmatpush3.bf16.msra.mxu1 %v3395_v35 }
 0x7f1   :  { %v1713_v38 = vrot.slane %v1699_v14, %v3503_v12  ;;  %v1714_v27 = vcombine.high %v1706_v18, %v1706_v18  ;;  %v1722_v32 = vrot.slane %v1706_v18, %v3503_v12  ;;  %2294 = vst.sshfl [vmem:[#allocation13 + $0x3] sm:$0x1 pattern:$0x73625140] %v1706_v18  ;;  %2414 = vmatprep.subr.bf16.mxu1 %v3397_v46 }
 0x7f3   :  { %v1715_v60 = vcombine.high %v1713_v38, %v1713_v38  ;;  %v1729_v40 = vrot.slane %v1713_v38, %v3503_v12  ;;  %v1736_v62 = vrot.slane %v1714_v27, %v3503_v12  ;;  %v1744_v44 = vcombine.high %v1722_v32, %v1722_v32  ;;  %2295 = vst.sshfl [vmem:[#allocation13 + $0xb] sm:$0x1 pattern:$0x73625140] %v1714_v27 }
 0x7f4   :  { %2296 = vst.sshfl [vmem:[#allocation13 + $0x23] sm:$0x1 pattern:$0x73625140] %v1713_v38  ;;  %2415 = vmatpush3.bf16.msra.mxu1 %v3401_v47 }
 0x7f5   :  { %v1743_v52 = vrot.slane %v1715_v60, %v3503_v12  ;;  %v1745_v56 = vcombine.high %v1729_v40, %v1729_v40  ;;  %v1746_v19 = vcombine.high %v1736_v62, %v1736_v62  ;;  %1758 = vst [vmem:[#allocation13 + $0x13] sm:$0x1] %v1744_v44  ;;  %2297 = vst.sshfl [vmem:[#allocation13 + $0x2b] sm:$0x1 pattern:$0x73625140] %v1715_v60  ;;  %2416 = vmatprep.subr.bf16.mxu1 %v3403_v63 }
 0x7f7   :  { %v1747_v28 = vcombine.high %v1743_v52, %v1743_v52  ;;  %1759 = vst [vmem:[#allocation13 + $0x1b] sm:$0x1] %v1746_v19  ;;  %1762 = vst [vmem:[#allocation13 + $0x33] sm:$0x1] %v1745_v56 }
 0x7f8   :  { %2417 = vmatpush3.bf16.msra.mxu1 %v3407_v42 }
 0x7f9   :  { %1763 = vst [vmem:[#allocation13 + $0x3b] sm:$0x1] %v1747_v28  ;;  %2446 = vmatprep.subr.bf16.mxu1 %v3361_v41 }
 0x7fb   :  { %1801 = vmatmul.mubr.bf16.vlgmr.msra.gmra.mrb[24].mxu1 %v3323_v5 }
 0x7fc   :  { %2447 = vmatpush3.bf16.msra.mxu1 %v3363_v30  ;;  %2020 = vmatprep.mubr.bf16.mxu1 %v3186_v10 }
 0x7fd   :  { %2448 = vmatprep.subr.bf16.mxu1 %v3366_v26 }
 0x800   :  { %2449 = vmatpush3.bf16.msra.mxu1 %v3371_v13 }
 0x801   :  { %2450 = vmatprep.subr.bf16.mxu1 %v3373_v9 }
 0x804   :  { %2451 = vmatpush3.bf16.msra.mxu1 %v3377_v21 }
 0x805   :  { %2452 = vmatprep.subr.bf16.mxu1 %v3379_v24 }
 0x808   :  { %2453 = vmatpush3.bf16.msra.mxu1 %v3383_v29 }
 0x809   :  { %v2440_v51 = vpop.f32.mrb[40].mxu0  ;;  %2454 = vmatprep.subr.bf16.mxu1 %v3385_v55 }
 0x80a   :  { %v2441_v5 = vpop.f32.mrb[41].mxu0 }
 0x80b   :  { %v2442_v41 = vadd.f32 %v2441_v5, %v2440_v51  ;;  %v2443_v30 = vpop.f32.mrb[42].mxu0 }
 0x80c   :  { %v2444_v59 = vpop.f32.mrb[43].mxu0  ;;  %2455 = vmatpush3.bf16.msra.mxu1 %v3389_v45 }
 0x80d   :  { %v1913_v10 = vadd.f32 %v2442_v41, %v3500_v8  ;;  %2456 = vmatprep.subr.bf16.mxu1 %v3391_v16 }
 0x80f   :  { %v1919_v26 = vcombine.high %v1913_v10, %v1913_v10  ;;  %v1926_v13 = vrot.slane %v1913_v10, %v3503_v12 }
 0x810   :  { %2457 = vmatpush3.bf16.msra.mxu1 %v3395_v35 }
 0x811   :  { %v1933_v9 = vrot.slane %v1919_v26, %v3503_v12  ;;  %v1934_v21 = vcombine.high %v1926_v13, %v1926_v13  ;;  %v1942_v24 = vrot.slane %v1926_v13, %v3503_v12  ;;  %2302 = vst.sshfl [vmem:[#allocation13 + $0x5] sm:$0x1 pattern:$0x73625140] %v1926_v13  ;;  %2458 = vmatprep.subr.bf16.mxu1 %v3397_v46 }
 0x813   :  { %v1935_v29 = vcombine.high %v1933_v9, %v1933_v9  ;;  %v1949_v55 = vrot.slane %v1933_v9, %v3503_v12  ;;  %v1956_v45 = vrot.slane %v1934_v21, %v3503_v12  ;;  %v1964_v33 = vcombine.high %v1942_v24, %v1942_v24  ;;  %2303 = vst.sshfl [vmem:[#allocation13 + $0xd] sm:$0x1 pattern:$0x73625140] %v1934_v21 }
 0x814   :  { %2304 = vst.sshfl [vmem:[#allocation13 + $0x25] sm:$0x1 pattern:$0x73625140] %v1933_v9  ;;  %2459 = vmatpush3.bf16.msra.mxu1 %v3401_v47 }
 0x815   :  { %v1963_v16 = vrot.slane %v1935_v29, %v3503_v12  ;;  %v1965_v35 = vcombine.high %v1949_v55, %v1949_v55  ;;  %v1966_v4 = vcombine.high %v1956_v45, %v1956_v45  ;;  %1978 = vst [vmem:[#allocation13 + $0x15] sm:$0x1] %v1964_v33  ;;  %2305 = vst.sshfl [vmem:[#allocation13 + $0x2d] sm:$0x1 pattern:$0x73625140] %v1935_v29  ;;  %2460 = vmatprep.subr.bf16.mxu1 %v3403_v63 }
 0x817   :  { %v1967_v25 = vcombine.high %v1963_v16, %v1963_v16  ;;  %1979 = vst [vmem:[#allocation13 + $0x1d] sm:$0x1] %v1966_v4  ;;  %1982 = vst [vmem:[#allocation13 + $0x35] sm:$0x1] %v1965_v35 }
 0x818   :  { %2461 = vmatpush3.bf16.msra.mxu1 %v3407_v42 }
 0x819   :  { %1983 = vst [vmem:[#allocation13 + $0x3d] sm:$0x1] %v1967_v25 }
 0x81b   :  { %2021 = vmatmul.mubr.bf16.vlgmr.msra.gmra.mrb[28].mxu1 %v3413_v36 }
 0x88c   :  { %v2484_v46 = vpop.f32.mrb[44].mxu0 }
 0x88d   :  { %v2485_v58 = vpop.f32.mrb[45].mxu0 }
 0x88e   :  { %v2486_v61 = vadd.f32 %v2485_v58, %v2484_v46  ;;  %v2330_v47 = vpop.f32.mrb[16].mxu1  ;;  %v2487_v34 = vpop.f32.mrb[46].mxu0 }
 0x88f   :  { %v2331_v0 = vpop.f32.mrb[17].mxu1  ;;  %v2488_v3 = vpop.f32.mrb[47].mxu0 }
 0x890   :  { %v2133_v17 = vadd.f32 %v2486_v61, %v3500_v8  ;;  %v2332_v22 = vadd.f32 %v2331_v0, %v2330_v47  ;;  %v2333_v15 = vpop.f32.mrb[18].mxu1 }
 0x891   :  { %v2334_v63 = vpop.f32.mrb[19].mxu1 }
 0x892   :  { %v2139_v31 = vcombine.high %v2133_v17, %v2133_v17  ;;  %v2146_v54 = vrot.slane %v2133_v17, %v3503_v12  ;;  %v1363_v42 = vadd.f32 %v2332_v22, %v3500_v8 }
 0x894   :  { %v2153_v2 = vrot.slane %v2139_v31, %v3503_v12  ;;  %v2154_v36 = vcombine.high %v2146_v54, %v2146_v54  ;;  %v2162_v53 = vrot.slane %v2146_v54, %v3503_v12  ;;  %2310 = vst.sshfl [vmem:[#allocation13 + $0x7] sm:$0x1 pattern:$0x73625140] %v2146_v54  ;;  %v1369_v50 = vcombine.high %v1363_v42, %v1363_v42 }
 0x895   :  { %v1376_v7 = vrot.slane %v1363_v42, %v3503_v12 }
 0x896   :  { %v2155_v39 = vcombine.high %v2153_v2, %v2153_v2  ;;  %v2169_v48 = vrot.slane %v2153_v2, %v3503_v12  ;;  %v2176_v49 = vrot.slane %v2154_v36, %v3503_v12  ;;  %v2184_v6 = vcombine.high %v2162_v53, %v2162_v53  ;;  %2311 = vst.sshfl [vmem:[#allocation13 + $0xf] sm:$0x1 pattern:$0x73625140] %v2154_v36 }
 0x897   :  { %2312 = vst.sshfl [vmem:[#allocation13 + $0x27] sm:$0x1 pattern:$0x73625140] %v2153_v2  ;;  %v1383_v23 = vrot.slane %v1369_v50, %v3503_v12  ;;  %v1384_v1 = vcombine.high %v1376_v7, %v1376_v7  ;;  %v1392_v57 = vrot.slane %v1376_v7, %v3503_v12 }
 0x898   :  { %2282 = vst.sshfl [vmem:[#allocation13] sm:$0x1 pattern:$0x73625140] %v1376_v7  ;;  %v2183_v11 = vrot.slane %v2155_v39, %v3503_v12  ;;  %v2185_v43 = vcombine.high %v2169_v48, %v2169_v48  ;;  %v2186_v20 = vcombine.high %v2176_v49, %v2176_v49  ;;  %2198 = vst [vmem:[#allocation13 + $0x17] sm:$0x1] %v2184_v6 }
 0x899   :  { %2313 = vst.sshfl [vmem:[#allocation13 + $0x2f] sm:$0x1 pattern:$0x73625140] %v2155_v39  ;;  %v1385_v37 = vcombine.high %v1383_v23, %v1383_v23  ;;  %v1399_v14 = vrot.slane %v1383_v23, %v3503_v12  ;;  %v1406_v18 = vrot.slane %v1384_v1, %v3503_v12  ;;  %v1414_v38 = vcombine.high %v1392_v57, %v1392_v57 }
 0x89a   :  { %2283 = vst.sshfl [vmem:[#allocation13 + $0x8] sm:$0x1 pattern:$0x73625140] %v1384_v1  ;;  %v2187_v27 = vcombine.high %v2183_v11, %v2183_v11  ;;  %2199 = vst [vmem:[#allocation13 + $0x1f] sm:$0x1] %v2186_v20 }
 0x89b   :  { %2284 = vst.sshfl [vmem:[#allocation13 + $0x20] sm:$0x1 pattern:$0x73625140] %v1383_v23  ;;  %2202 = vst [vmem:[#allocation13 + $0x37] sm:$0x1] %v2185_v43  ;;  %v1413_v32 = vrot.slane %v1385_v37, %v3503_v12  ;;  %v1415_v60 = vcombine.high %v1399_v14, %v1399_v14  ;;  %v1416_v40 = vcombine.high %v1406_v18, %v1406_v18 }
 0x89c   :  { %1428 = vst [vmem:[#allocation13 + $0x10] sm:$0x1] %v1414_v38  ;;  %2285 = vst.sshfl [vmem:[#allocation13 + $0x28] sm:$0x1 pattern:$0x73625140] %v1385_v37 }
 0x89d   :  { %2203 = vst [vmem:[#allocation13 + $0x3f] sm:$0x1] %v2187_v27  ;;  %v1417_v62 = vcombine.high %v1413_v32, %v1413_v32  ;;  %1429 = vst [vmem:[#allocation13 + $0x18] sm:$0x1] %v1416_v40 }
 0x89e   :  { %1432 = vst [vmem:[#allocation13 + $0x30] sm:$0x1] %v1415_v60 }
 0x89f   :  { %1433 = vst [vmem:[#allocation13 + $0x38] sm:$0x1] %v1417_v62 }
 0x8ae   :  { %v2374_v44 = vpop.f32.mrb[20].mxu1 }
 0x8af   :  { %v2375_v52 = vpop.f32.mrb[21].mxu1 }
 0x8b0   :  { %v2376_v56 = vadd.f32 %v2375_v52, %v2374_v44  ;;  %v2377_v19 = vpop.f32.mrb[22].mxu1 }
 0x8b1   :  { %v2378_v28 = vpop.f32.mrb[23].mxu1 }
 0x8b2   :  { %v1583_v51 = vadd.f32 %v2376_v56, %v3500_v8 }
 0x8b4   :  { %v1589_v5 = vcombine.high %v1583_v51, %v1583_v51  ;;  %v1596_v41 = vrot.slane %v1583_v51, %v3503_v12 }
 0x8b6   :  { %v1603_v30 = vrot.slane %v1589_v5, %v3503_v12  ;;  %v1604_v59 = vcombine.high %v1596_v41, %v1596_v41  ;;  %v1612_v10 = vrot.slane %v1596_v41, %v3503_v12  ;;  %2290 = vst.sshfl [vmem:[#allocation13 + $0x2] sm:$0x1 pattern:$0x73625140] %v1596_v41 }
 0x8b8   :  { %v1605_v26 = vcombine.high %v1603_v30, %v1603_v30  ;;  %v1619_v13 = vrot.slane %v1603_v30, %v3503_v12  ;;  %v1626_v9 = vrot.slane %v1604_v59, %v3503_v12  ;;  %v1634_v21 = vcombine.high %v1612_v10, %v1612_v10  ;;  %2291 = vst.sshfl [vmem:[#allocation13 + $0xa] sm:$0x1 pattern:$0x73625140] %v1604_v59 }
 0x8b9   :  { %2292 = vst.sshfl [vmem:[#allocation13 + $0x22] sm:$0x1 pattern:$0x73625140] %v1603_v30 }
 0x8ba   :  { %v1633_v24 = vrot.slane %v1605_v26, %v3503_v12  ;;  %v1635_v29 = vcombine.high %v1619_v13, %v1619_v13  ;;  %v1636_v55 = vcombine.high %v1626_v9, %v1626_v9  ;;  %1648 = vst [vmem:[#allocation13 + $0x12] sm:$0x1] %v1634_v21  ;;  %2293 = vst.sshfl [vmem:[#allocation13 + $0x2a] sm:$0x1 pattern:$0x73625140] %v1605_v26 }
 0x8bc   :  { %v1637_v45 = vcombine.high %v1633_v24, %v1633_v24  ;;  %1649 = vst [vmem:[#allocation13 + $0x1a] sm:$0x1] %v1636_v55  ;;  %1652 = vst [vmem:[#allocation13 + $0x32] sm:$0x1] %v1635_v29 }
 0x8be   :  { %1653 = vst [vmem:[#allocation13 + $0x3a] sm:$0x1] %v1637_v45 }
 0x8ce   :  { %v2418_v33 = vpop.f32.mrb[24].mxu1 }
 0x8cf   :  { %v2419_v16 = vpop.f32.mrb[25].mxu1 }
 0x8d0   :  { %v2420_v35 = vadd.f32 %v2419_v16, %v2418_v33  ;;  %v2421_v4 = vpop.f32.mrb[26].mxu1 }
 0x8d1   :  { %v2422_v25 = vpop.f32.mrb[27].mxu1 }
 0x8d2   :  { %v1803_v46 = vadd.f32 %v2420_v35, %v3500_v8 }
 0x8d4   :  { %v1809_v58 = vcombine.high %v1803_v46, %v1803_v46  ;;  %v1816_v61 = vrot.slane %v1803_v46, %v3503_v12 }
 0x8d6   :  { %v1823_v47 = vrot.slane %v1809_v58, %v3503_v12  ;;  %v1824_v34 = vcombine.high %v1816_v61, %v1816_v61  ;;  %v1832_v0 = vrot.slane %v1816_v61, %v3503_v12  ;;  %2298 = vst.sshfl [vmem:[#allocation13 + $0x4] sm:$0x1 pattern:$0x73625140] %v1816_v61 }
 0x8d8   :  { %v1825_v3 = vcombine.high %v1823_v47, %v1823_v47  ;;  %v1839_v17 = vrot.slane %v1823_v47, %v3503_v12  ;;  %v1846_v22 = vrot.slane %v1824_v34, %v3503_v12  ;;  %v1854_v15 = vcombine.high %v1832_v0, %v1832_v0  ;;  %2299 = vst.sshfl [vmem:[#allocation13 + $0xc] sm:$0x1 pattern:$0x73625140] %v1824_v34 }
 0x8d9   :  { %2300 = vst.sshfl [vmem:[#allocation13 + $0x24] sm:$0x1 pattern:$0x73625140] %v1823_v47 }
 0x8da   :  { %v1853_v63 = vrot.slane %v1825_v3, %v3503_v12  ;;  %v1855_v31 = vcombine.high %v1839_v17, %v1839_v17  ;;  %v1856_v54 = vcombine.high %v1846_v22, %v1846_v22  ;;  %1868 = vst [vmem:[#allocation13 + $0x14] sm:$0x1] %v1854_v15  ;;  %2301 = vst.sshfl [vmem:[#allocation13 + $0x2c] sm:$0x1 pattern:$0x73625140] %v1825_v3 }
 0x8dc   :  { %v1857_v42 = vcombine.high %v1853_v63, %v1853_v63  ;;  %1869 = vst [vmem:[#allocation13 + $0x1c] sm:$0x1] %v1856_v54  ;;  %1872 = vst [vmem:[#allocation13 + $0x34] sm:$0x1] %v1855_v31 }
 0x8de   :  { %1873 = vst [vmem:[#allocation13 + $0x3c] sm:$0x1] %v1857_v42 }
 0x8ee   :  { %v2462_v2 = vpop.f32.mrb[28].mxu1 }
 0x8ef   :  { %v2463_v36 = vpop.f32.mrb[29].mxu1 }
 0x8f0   :  { %v2464_v53 = vadd.f32 %v2463_v36, %v2462_v2  ;;  %v2465_v50 = vpop.f32.mrb[30].mxu1 }
 0x8f1   :  { %v2466_v7 = vpop.f32.mrb[31].mxu1 }
 0x8f2   :  { %v2023_v39 = vadd.f32 %v2464_v53, %v3500_v8 }
 0x8f4   :  { %v2029_v48 = vcombine.high %v2023_v39, %v2023_v39  ;;  %v2036_v49 = vrot.slane %v2023_v39, %v3503_v12 }
 0x8f6   :  { %v2043_v6 = vrot.slane %v2029_v48, %v3503_v12  ;;  %v2044_v23 = vcombine.high %v2036_v49, %v2036_v49  ;;  %v2052_v1 = vrot.slane %v2036_v49, %v3503_v12  ;;  %2306 = vst.sshfl [vmem:[#allocation13 + $0x6] sm:$0x1 pattern:$0x73625140] %v2036_v49 }
 0x8f8   :  { %v2045_v57 = vcombine.high %v2043_v6, %v2043_v6  ;;  %v2059_v11 = vrot.slane %v2043_v6, %v3503_v12  ;;  %v2066_v43 = vrot.slane %v2044_v23, %v3503_v12  ;;  %v2074_v20 = vcombine.high %v2052_v1, %v2052_v1  ;;  %2307 = vst.sshfl [vmem:[#allocation13 + $0xe] sm:$0x1 pattern:$0x73625140] %v2044_v23 }
 0x8f9   :  { %2308 = vst.sshfl [vmem:[#allocation13 + $0x26] sm:$0x1 pattern:$0x73625140] %v2043_v6 }
 0x8fa   :  { %v2073_v8 = vrot.slane %v2045_v57, %v3503_v12  ;;  %v2075_v37 = vcombine.high %v2059_v11, %v2059_v11  ;;  %v2076_v14 = vcombine.high %v2066_v43, %v2066_v43  ;;  %2088 = vst [vmem:[#allocation13 + $0x16] sm:$0x1] %v2074_v20  ;;  %2309 = vst.sshfl [vmem:[#allocation13 + $0x2e] sm:$0x1 pattern:$0x73625140] %v2045_v57 }
 0x8fc   :  { %v2077_v18 = vcombine.high %v2073_v8, %v2073_v8  ;;  %2089 = vst [vmem:[#allocation13 + $0x1e] sm:$0x1] %v2076_v14  ;;  %2092 = vst [vmem:[#allocation13 + $0x36] sm:$0x1] %v2075_v37 }
 0x8fe   :  { %2093 = vst [vmem:[#allocation13 + $0x3e] sm:$0x1] %v2077_v18 }
 0x8ff   :  { %2720 = shalt.err (!%p2717_p8)
}
 0x900   :  { %s2721_s29 = scalar_lea.hbm %s3626_s6, 1024 }
 0x901   :  { %p2722_p9 = scmp.ne.s32.totalorder %s3626_s6, %s2721_s29  ;;  %p2725_p10 = scmp.lt.u32.totalorder %s2721_s29, %s3626_s6 }
 0x903   :  { %p2727_p11 = pnand %p2725_p10, %p2722_p9 }
 0x905   :  { %2730 = shalt.err (!%p2727_p11)
}
 0x906   :  { %2215 = dma.vmem_to_hbm [thread:$0]  %s2210_s25, 1024, %s3626_s6, [#allocation7], %s2740_s7, %s2740_s7, %s2741_s8  }
 0x907   :  { %2737 = dma.done.wait [#allocation7], 1024  }
 0x908   :  { %2738 = vsyncadd [#allocation7], 4294966272 }
 0x909   :  { %2219 = vsyncpa [#allocation6], 1 }
 0x90a   :  { %2220 = vsyncpa [#allocation9], 1 }
 0x90b   :  { %2221 = vsyncpa [#allocation12], 1 }
 0x90c   :  { %2222 = vsyncpa [#allocation7], 1 }

</bundles_post_ra>
